<compile_context>
chip_gen: v7x
topology: tpu7x:2x2x1
jax: 0.10.0
libtpu: 0.0.40
codegen_flags: <defaults>
</compile_context>

<pallas_src>
import jax
import jax.numpy as jnp
from jax.experimental import pallas as pl
from jax.experimental.pallas import tpu as pltpu

IN_FEATURES = 2
HIDDEN = 512
OUT_FEATURES = 2
LANES = 128  # lane-dense padded output width


def resnet_kernel(x_ref,
                  w1_ref, b1_ref,
                  w2_ref, b2_ref,
                  w3_ref, b3_ref,
                  w4_ref, b4_ref,
                  out_ref):
    """One batch tile of the MLP + residual, fully VMEM resident.

    x_ref:          (bb, LANES) f32   flattened input; lanes >= IN_FEATURES are zero
    w1_ref:         (IN_FEATURES, HIDDEN) f32   layer 1 runs on the VPU (K=2)
    w2_ref, w3_ref: (HIDDEN, HIDDEN) bf16       MXU matmuls, f32 accumulation
    w4_ref:         (HIDDEN, LANES) bf16        lane-padded output projection
    b*_ref:         (1, ...) f32
    out_ref:        (bb, LANES) f32             lane-dense store; wrapper slices [:, :2]
    """
    x = x_ref[...]                                            # (bb, LANES) f32

    # Layer 1: (bb,2)@(2,512). K=2 would waste an MXU pass, so do it on the VPU as a
    # broadcasted outer product (free-ish under the MXU-bound hidden layers).
    h = (x[:, 0:1] * w1_ref[0:1, :]
         + x[:, 1:2] * w1_ref[1:2, :]
         + b1_ref[...])                                       # (bb, HIDDEN) f32
    h = jnp.maximum(h, 0.0)

    # Layers 2 & 3: bf16 MXU matmuls, f32 accumulation, bias + ReLU in f32.
    h = jnp.dot(h.astype(jnp.bfloat16), w2_ref[...],
                preferred_element_type=jnp.float32) + b2_ref[...]
    h = jnp.maximum(h, 0.0)

    h = jnp.dot(h.astype(jnp.bfloat16), w3_ref[...],
                preferred_element_type=jnp.float32) + b3_ref[...]
    h = jnp.maximum(h, 0.0)

    # Layer 4 + residual: output padded to LANES so the store is a full (unmasked) vreg
    # store. Padded lanes of w4/b4/x are zero, so padded output lanes stay zero.
    y = jnp.dot(h.astype(jnp.bfloat16), w4_ref[...],
                preferred_element_type=jnp.float32) + b4_ref[...]
    out_ref[...] = (y + x).astype(out_ref.dtype)


def resnet_forward(x, prepared, *, block_b=1024, vmem_limit_bytes=None):
    """x: any shape whose flatten gives (B, IN_FEATURES). `prepared` from prepare_params()."""
    B = x.shape[0]
    x2 = x.reshape(B, -1).astype(jnp.float32)
    assert x2.shape[1] == IN_FEATURES, x2.shape

    # ---- batch-tile selection ----------------------------------------------------
    # Large tiles amortize the ~0.35us/grid-step overhead; bb=1024 keeps the per-tile
    # activation footprint (~3 x bb*512*4B) within even v5e's 16 MiB default scoped VMEM
    # and well under v7x's 64 MiB physical VMEM.
    bb = max(8, min(block_b, ((B + 7) // 8) * 8))
    bb = ((bb + 7) // 8) * 8
    B_pad = ((B + bb - 1) // bb) * bb
    # If a large batch fits a single tile, split it into 2 tiles so the "parallel"
    # grid axis can shard across both TensorCores on v7x (on single-TC v5e/v6e this
    # only adds one ~0.35us step).
    if B_pad // bb == 1 and B >= 512:
        bb = ((B + 15) // 16) * 8
        B_pad = ((B + bb - 1) // bb) * bb

    # Lane-dense input slab: (B_pad, LANES); real data in lanes [0, IN_FEATURES).
    x_slab = jnp.zeros((B_pad, LANES), jnp.float32).at[:B, :IN_FEATURES].set(x2)

    grid = (B_pad // bb,)

    full = lambda i: (0, 0)  # weights / biases: whole-array block, VMEM resident
    # Constant-index blocks never change across the grid -> single-buffer them to
    # halve their VMEM footprint.
    wspec = lambda shape: pl.BlockSpec(shape, full, pipeline_mode=pl.Buffered(1))

    cp_kwargs = dict(dimension_semantics=("parallel",))
    if vmem_limit_bytes is not None:
        cp_kwargs["vmem_limit_bytes"] = vmem_limit_bytes

    out = pl.pallas_call(
        resnet_kernel,
        out_shape=jax.ShapeDtypeStruct((B_pad, LANES), jnp.float32),
        grid_spec=pltpu.PrefetchScalarGridSpec(
            num_scalar_prefetch=0,
            grid=grid,
            in_specs=[
                pl.BlockSpec((bb, LANES), lambda i: (i, 0)),
                wspec((IN_FEATURES, HIDDEN)),
                wspec((1, HIDDEN)),
                wspec((HIDDEN, HIDDEN)),
                wspec((1, HIDDEN)),
                wspec((HIDDEN, HIDDEN)),
                wspec((1, HIDDEN)),
                wspec((HIDDEN, LANES)),
                wspec((1, LANES)),
            ],
            out_specs=pl.BlockSpec((bb, LANES), lambda i: (i, 0)),
        ),
        compiler_params=pltpu.CompilerParams(**cp_kwargs),
    )(x_slab,
      prepared["w1"], prepared["b1"],
      prepared["w2"], prepared["b2"],
      prepared["w3"], prepared["b3"],
      prepared["w4"], prepared["b4"])

    return out[:B, :OUT_FEATURES]


def init_params(key):
    """Deterministic init mimicking PyTorch nn.Linear: U(-1/sqrt(fan_in), 1/sqrt(fan_in)).

    Weights are stored transposed relative to PyTorch, i.e. (in_features, out_features).
    """
    keys = jax.random.split(key, 8)

    def u(kk, shape, fan_in):
        k = 1.0 / jnp.sqrt(jnp.float32(fan_in))
        return jax.random.uniform(kk, shape, jnp.float32, minval=-k, maxval=k)

    return dict(
        w1=u(keys[0], (IN_FEATURES, HIDDEN), IN_FEATURES),
        b1=u(keys[1], (1, HIDDEN), IN_FEATURES),
        w2=u(keys[2], (HIDDEN, HIDDEN), HIDDEN),
        b2=u(keys[3], (1, HIDDEN), HIDDEN),
        w3=u(keys[4], (HIDDEN, HIDDEN), HIDDEN),
        b3=u(keys[5], (1, HIDDEN), HIDDEN),
        w4=u(keys[6], (HIDDEN, OUT_FEATURES), HIDDEN),
        b4=u(keys[7], (1, OUT_FEATURES), HIDDEN),
    )


def prepare_params(params):
    """One-time prep for the kernel: bf16-cast the MXU weights and lane-pad layer 4."""
    w4p = (jnp.zeros((HIDDEN, LANES), jnp.bfloat16)
           .at[:, :OUT_FEATURES].set(params["w4"].astype(jnp.bfloat16)))
    b4p = (jnp.zeros((1, LANES), jnp.float32)
           .at[:, :OUT_FEATURES].set(params["b4"]))
    return dict(
        w1=params["w1"].astype(jnp.float32),   # layer 1 stays f32 on the VPU
        b1=params["b1"].astype(jnp.float32),
        w2=params["w2"].astype(jnp.bfloat16),
        b2=params["b2"].astype(jnp.float32),
        w3=params["w3"].astype(jnp.bfloat16),
        b3=params["b3"].astype(jnp.float32),
        w4=w4p,
        b4=b4p,
    )


def resnet_reference(x, params):
    """Pure-JAX f32 reference matching the PyTorch ResNet forward."""
    B = x.shape[0]
    x2 = x.reshape(B, -1).astype(jnp.float32)
    h = jnp.maximum(x2 @ params["w1"] + params["b1"], 0.0)
    h = jnp.maximum(h @ params["w2"] + params["b2"], 0.0)
    h = jnp.maximum(h @ params["w3"] + params["b3"], 0.0)
    return h @ params["w4"] + params["b4"] + x2


if __name__ == "__main__":
    key = jax.random.PRNGKey(0)
    k_x, k_p = jax.random.split(key)

    B = 16
    x = jax.random.normal(k_x, (B, IN_FEATURES), jnp.float32)
    params = init_params(k_p)
    prepared = prepare_params(params)

    out = jax.block_until_ready(resnet_forward(x, prepared))
    ref = jax.block_until_ready(resnet_reference(x, params))

    assert out.shape == (B, OUT_FEATURES), out.shape
    # bf16 MXU operands (f32 accumulation): relax tolerance vs. the pure-f32 reference.
    assert jnp.allclose(out, ref, rtol=2e-2, atol=2e-2), float(jnp.max(jnp.abs(out - ref)))
    print("KERNEL_OK")
</pallas_src>

<mosaic_0001>
module attributes {stable_mosaic.version = 11 : i64} {
  func.func @resnet_kernel(%arg0: i32, %arg1: memref<16x128xf32, #tpu.memory_space<vmem>>, %arg2: memref<2x512xf32, #tpu.memory_space<vmem>>, %arg3: memref<1x512xf32, #tpu.memory_space<vmem>>, %arg4: memref<512x512xbf16, #tpu.memory_space<vmem>>, %arg5: memref<1x512xf32, #tpu.memory_space<vmem>>, %arg6: memref<512x512xbf16, #tpu.memory_space<vmem>>, %arg7: memref<1x512xf32, #tpu.memory_space<vmem>>, %arg8: memref<512x128xbf16, #tpu.memory_space<vmem>>, %arg9: memref<1x128xf32, #tpu.memory_space<vmem>>, %arg10: memref<16x128xf32, #tpu.memory_space<vmem>>) attributes {dimension_semantics = [#tpu.dimension_semantics<parallel>], iteration_bounds = array<i64: 1>, scalar_prefetch = 0 : i64, scratch_operands = 0 : i64, tpu.core_type = #tpu.core_type<tc>, window_params = [{transform_indices = @transform_0, window_bounds = array<i64: 16, 128>}, {pipeline_mode = #tpu.pipeline_mode<synchronous>, transform_indices = @transform_1, window_bounds = array<i64: 2, 512>}, {pipeline_mode = #tpu.pipeline_mode<synchronous>, transform_indices = @transform_2, window_bounds = array<i64: 1, 512>}, {pipeline_mode = #tpu.pipeline_mode<synchronous>, transform_indices = @transform_3, window_bounds = array<i64: 512, 512>}, {pipeline_mode = #tpu.pipeline_mode<synchronous>, transform_indices = @transform_4, window_bounds = array<i64: 1, 512>}, {pipeline_mode = #tpu.pipeline_mode<synchronous>, transform_indices = @transform_5, window_bounds = array<i64: 512, 512>}, {pipeline_mode = #tpu.pipeline_mode<synchronous>, transform_indices = @transform_6, window_bounds = array<i64: 1, 512>}, {pipeline_mode = #tpu.pipeline_mode<synchronous>, transform_indices = @transform_7, window_bounds = array<i64: 512, 128>}, {pipeline_mode = #tpu.pipeline_mode<synchronous>, transform_indices = @transform_8, window_bounds = array<i64: 1, 128>}, {transform_indices = @transform_9, window_bounds = array<i64: 16, 128>}]} {
    %c0 = arith.constant 0 : index
    %c0_0 = arith.constant 0 : index
    %0 = vector.load %arg1[%c0, %c0_0] : memref<16x128xf32, #tpu.memory_space<vmem>>, vector<16x128xf32>
    %1 = vector.extract_strided_slice %0 {offsets = [0, 0], sizes = [16, 1], strides = [1, 1]} : vector<16x128xf32> to vector<16x1xf32>
    %c0_1 = arith.constant 0 : index
    %c0_2 = arith.constant 0 : index
    %2 = vector.load %arg2[%c0_1, %c0_2] : memref<2x512xf32, #tpu.memory_space<vmem>>, vector<1x512xf32>
    %3 = vector.broadcast %1 : vector<16x1xf32> to vector<16x512xf32>
    %4 = vector.broadcast %2 : vector<1x512xf32> to vector<16x512xf32>
    %5 = arith.mulf %3, %4 : vector<16x512xf32>
    %6 = vector.extract_strided_slice %0 {offsets = [0, 1], sizes = [16, 1], strides = [1, 1]} : vector<16x128xf32> to vector<16x1xf32>
    %c1 = arith.constant 1 : index
    %c0_3 = arith.constant 0 : index
    %7 = vector.load %arg2[%c1, %c0_3] : memref<2x512xf32, #tpu.memory_space<vmem>>, vector<1x512xf32>
    %8 = vector.broadcast %6 : vector<16x1xf32> to vector<16x512xf32>
    %9 = vector.broadcast %7 : vector<1x512xf32> to vector<16x512xf32>
    %10 = arith.mulf %8, %9 : vector<16x512xf32>
    %11 = arith.addf %5, %10 : vector<16x512xf32>
    %c0_4 = arith.constant 0 : index
    %c0_5 = arith.constant 0 : index
    %12 = vector.load %arg3[%c0_4, %c0_5] : memref<1x512xf32, #tpu.memory_space<vmem>>, vector<1x512xf32>
    %13 = vector.broadcast %12 : vector<1x512xf32> to vector<16x512xf32>
    %14 = arith.addf %11, %13 : vector<16x512xf32>
    %cst = arith.constant 0.000000e+00 : f32
    %15 = vector.broadcast %cst : f32 to vector<16x512xf32>
    %16 = arith.maximumf %14, %15 : vector<16x512xf32>
    %17 = arith.truncf %16 : vector<16x512xf32> to vector<16x512xbf16>
    %c0_6 = arith.constant 0 : index
    %c0_7 = arith.constant 0 : index
    %18 = vector.load %arg4[%c0_6, %c0_7] : memref<512x512xbf16, #tpu.memory_space<vmem>>, vector<512x512xbf16>
    %cst_8 = arith.constant dense<0.000000e+00> : vector<16x512xf32>
    %19 = tpu.matmul %17, %18, %cst_8 {dimension_numbers = #tpu.dot_dimension_numbers<[1], [0], [0], [1], [0, 0, 1, 1], [], []>} : vector<16x512xbf16>, vector<512x512xbf16>, vector<16x512xf32> -> vector<16x512xf32>
    %c0_9 = arith.constant 0 : index
    %c0_10 = arith.constant 0 : index
    %20 = vector.load %arg5[%c0_9, %c0_10] : memref<1x512xf32, #tpu.memory_space<vmem>>, vector<1x512xf32>
    %21 = vector.broadcast %20 : vector<1x512xf32> to vector<16x512xf32>
    %22 = arith.addf %19, %21 : vector<16x512xf32>
    %cst_11 = arith.constant 0.000000e+00 : f32
    %23 = vector.broadcast %cst_11 : f32 to vector<16x512xf32>
    %24 = arith.maximumf %22, %23 : vector<16x512xf32>
    %25 = arith.truncf %24 : vector<16x512xf32> to vector<16x512xbf16>
    %c0_12 = arith.constant 0 : index
    %c0_13 = arith.constant 0 : index
    %26 = vector.load %arg6[%c0_12, %c0_13] : memref<512x512xbf16, #tpu.memory_space<vmem>>, vector<512x512xbf16>
    %cst_14 = arith.constant dense<0.000000e+00> : vector<16x512xf32>
    %27 = tpu.matmul %25, %26, %cst_14 {dimension_numbers = #tpu.dot_dimension_numbers<[1], [0], [0], [1], [0, 0, 1, 1], [], []>} : vector<16x512xbf16>, vector<512x512xbf16>, vector<16x512xf32> -> vector<16x512xf32>
    %c0_15 = arith.constant 0 : index
    %c0_16 = arith.constant 0 : index
    %28 = vector.load %arg7[%c0_15, %c0_16] : memref<1x512xf32, #tpu.memory_space<vmem>>, vector<1x512xf32>
    %29 = vector.broadcast %28 : vector<1x512xf32> to vector<16x512xf32>
    %30 = arith.addf %27, %29 : vector<16x512xf32>
    %cst_17 = arith.constant 0.000000e+00 : f32
    %31 = vector.broadcast %cst_17 : f32 to vector<16x512xf32>
    %32 = arith.maximumf %30, %31 : vector<16x512xf32>
    %33 = arith.truncf %32 : vector<16x512xf32> to vector<16x512xbf16>
    %c0_18 = arith.constant 0 : index
    %c0_19 = arith.constant 0 : index
    %34 = vector.load %arg8[%c0_18, %c0_19] : memref<512x128xbf16, #tpu.memory_space<vmem>>, vector<512x128xbf16>
    %cst_20 = arith.constant dense<0.000000e+00> : vector<16x128xf32>
    %35 = tpu.matmul %33, %34, %cst_20 {dimension_numbers = #tpu.dot_dimension_numbers<[1], [0], [0], [1], [0, 0, 1, 1], [], []>} : vector<16x512xbf16>, vector<512x128xbf16>, vector<16x128xf32> -> vector<16x128xf32>
    %c0_21 = arith.constant 0 : index
    %c0_22 = arith.constant 0 : index
    %36 = vector.load %arg9[%c0_21, %c0_22] : memref<1x128xf32, #tpu.memory_space<vmem>>, vector<1x128xf32>
    %37 = vector.broadcast %36 : vector<1x128xf32> to vector<16x128xf32>
    %38 = arith.addf %35, %37 : vector<16x128xf32>
    %39 = arith.addf %38, %0 : vector<16x128xf32>
    %c0_23 = arith.constant 0 : index
    %c0_24 = arith.constant 0 : index
    %40 = vector.load %arg10[%c0_23, %c0_24] : memref<16x128xf32, #tpu.memory_space<vmem>>, vector<16x128xf32>
    tpu.vector_store %arg10[%c0_23, %c0_24], %39 {strides = array<i32>} : memref<16x128xf32, #tpu.memory_space<vmem>>, vector<16x128xf32>,
    return
  }
  func.func @transform_0(%arg0: i32) -> (i32, i32) {
    %c0_i32 = arith.constant 0 : i32
    %c0_i32_0 = arith.constant 0 : i32
    return %arg0, %c0_i32 : i32, i32
  }
  func.func @transform_1(%arg0: i32) -> (i32, i32) {
    %c0_i32 = arith.constant 0 : i32
    %c0_i32_0 = arith.constant 0 : i32
    %c0_i32_1 = arith.constant 0 : i32
    return %c0_i32, %c0_i32_0 : i32, i32
  }
  func.func @transform_2(%arg0: i32) -> (i32, i32) {
    %c0_i32 = arith.constant 0 : i32
    %c0_i32_0 = arith.constant 0 : i32
    %c0_i32_1 = arith.constant 0 : i32
    return %c0_i32, %c0_i32_0 : i32, i32
  }
  func.func @transform_3(%arg0: i32) -> (i32, i32) {
    %c0_i32 = arith.constant 0 : i32
    %c0_i32_0 = arith.constant 0 : i32
    %c0_i32_1 = arith.constant 0 : i32
    return %c0_i32, %c0_i32_0 : i32, i32
  }
  func.func @transform_4(%arg0: i32) -> (i32, i32) {
    %c0_i32 = arith.constant 0 : i32
    %c0_i32_0 = arith.constant 0 : i32
    %c0_i32_1 = arith.constant 0 : i32
    return %c0_i32, %c0_i32_0 : i32, i32
  }
  func.func @transform_5(%arg0: i32) -> (i32, i32) {
    %c0_i32 = arith.constant 0 : i32
    %c0_i32_0 = arith.constant 0 : i32
    %c0_i32_1 = arith.constant 0 : i32
    return %c0_i32, %c0_i32_0 : i32, i32
  }
  func.func @transform_6(%arg0: i32) -> (i32, i32) {
    %c0_i32 = arith.constant 0 : i32
    %c0_i32_0 = arith.constant 0 : i32
    %c0_i32_1 = arith.constant 0 : i32
    return %c0_i32, %c0_i32_0 : i32, i32
  }
  func.func @transform_7(%arg0: i32) -> (i32, i32) {
    %c0_i32 = arith.constant 0 : i32
    %c0_i32_0 = arith.constant 0 : i32
    %c0_i32_1 = arith.constant 0 : i32
    return %c0_i32, %c0_i32_0 : i32, i32
  }
  func.func @transform_8(%arg0: i32) -> (i32, i32) {
    %c0_i32 = arith.constant 0 : i32
    %c0_i32_0 = arith.constant 0 : i32
    %c0_i32_1 = arith.constant 0 : i32
    return %c0_i32, %c0_i32_0 : i32, i32
  }
  func.func @transform_9(%arg0: i32) -> (i32, i32) {
    %c0_i32 = arith.constant 0 : i32
    %c0_i32_0 = arith.constant 0 : i32
    return %arg0, %c0_i32 : i32, i32
  }
}

</mosaic_0001>

<bundles_post_ra>
// kernel: tpu_custom_call.1
= control target key start
LH: loop header
LB: loop body
LE: loop exit
PB: predicated region body
PF: predicated region fallthrough
CT: control target
= control target key end

     0   :  { %14 = vsyncpa [#allocation3], 0  ;;  %s3683_s0 = inlined_call_operand.hbm [shape: f32[16,128], index: 0, kind: input, shape index: {}]   ;;  %s3684_s1 = inlined_call_operand.hbm [shape: f32[2,512], index: 1, kind: input, shape index: {}]   ;;  %s3685_s2 = inlined_call_operand.vmem [shape: f32[1,512], index: 2, kind: input, shape index: {}]   ;;  %s3686_s3 = inlined_call_operand.hbm [shape: bf16[512,512], index: 3, kind: input, shape index: {}]   ;;  %s3687_s4 = inlined_call_operand.vmem [shape: f32[1,512], index: 4, kind: input, shape index: {}]   ;;  %s3688_s5 = inlined_call_operand.hbm [shape: bf16[512,512], index: 5, kind: input, shape index: {}]   ;;  %s3689_s6 = inlined_call_operand.vmem [shape: f32[1,512], index: 6, kind: input, shape index: {}]   ;;  %s3690_s7 = inlined_call_operand.hbm [shape: bf16[512,128], index: 7, kind: input, shape index: {}]   ;;  %s3691_s8 = inlined_call_operand.vmem [shape: f32[1,128], index: 8, kind: input, shape index: {}]   ;;  %s3692_s9 = inlined_call_operand.hbm [shape: f32[16,128], index: 9, kind: output, shape index: {}]  }
   0x1   :  { %15 = vsyncpa [#allocation6], 0 }
   0x2   :  { %16 = vsyncpa [#allocation9], 0 }
   0x3   :  { %17 = vsyncpa [#allocation4], 0  ;;  %s3487_s30 = smov [#allocation5]   ;;  %s3347_s13 = scalar_lea.hbm %s3684_s1, 128 }
   0x4   :  { %s36_s10 = sshll.u32 %s3487_s30, 4  ;;  %p3348_p0 = scmp.ne.s32.totalorder %s3684_s1, %s3347_s13  ;;  %s37_s10 = int_to_ptr.vmem [resolvable:$true] %s36_s10 }
   0x5   :  { %p3351_p1 = scmp.lt.u32.totalorder %s3347_s13, %s3684_s1 }
   0x7   :  { %p3353_p2 = pnand %p3351_p1, %p3348_p0 }
   0x9   :  { %3356 = shalt.err (!%p3353_p2)
}
   0xa   :  { %s3357_s18 = scalar_lea.vmem %s37_s10, 128  ;;  %p3362_p4 = scmp.lt.s32.totalorder %s37_s10, %s37_s10 }
   0xb   :  { %p3358_p3 = scmp.ne.s32.totalorder %s37_s10, %s3357_s18  ;;  %p3363_p5 = scmp.lt.s32.totalorder %s3357_s18, %s3357_s18 }
   0xd   :  { %p3364_p6 = por %p3363_p5, %p3362_p4 }
   0xf   :  { %p3365_p7 = pnand %p3364_p6, %p3358_p3 }
  0x11   :  { %3368 = shalt.err (!%p3365_p7)
}
  0x12   :  { %39 = dma.hbm_to_vmem [thread:$0]  %s3684_s1, 128, %s37_s10, [#allocation6]  }
  0x13   :  { %s3488_s21 = smov [#allocation8]   ;;  %s3489_s23 = smov [#allocation2]  }
  0x14   :  { %s61_s22 = sshll.u32 %s3488_s21, 4  ;;  %s23_s24 = sshll.u32 %s3489_s23, 4  ;;  %s62_s22 = int_to_ptr.vmem [resolvable:$true] %s61_s22  ;;  %s24_s24 = int_to_ptr.vmem [resolvable:$true] %s23_s24 }
  0x15   :  { %s3369_s27 = scalar_lea.hbm %s3688_s5, 16384 }
  0x16   :  { %p3370_p8 = scmp.ne.s32.totalorder %s3688_s5, %s3369_s27  ;;  %p3373_p9 = scmp.lt.u32.totalorder %s3369_s27, %s3688_s5 }
  0x18   :  { %p3375_p10 = pnand %p3373_p9, %p3370_p8 }
  0x1a   :  { %3378 = shalt.err (!%p3375_p10)
}
  0x1b   :  { %s3379_s1 = scalar_lea.vmem %s62_s22, 16384  ;;  %p3384_p12 = scmp.lt.s32.totalorder %s62_s22, %s62_s22 }
  0x1c   :  { %p3380_p11 = scmp.ne.s32.totalorder %s62_s22, %s3379_s1  ;;  %p3385_p13 = scmp.lt.s32.totalorder %s3379_s1, %s3379_s1 }
  0x1e   :  { %p3386_p0 = por %p3385_p13, %p3384_p12 }
  0x20   :  { %p3387_p1 = pnand %p3386_p0, %p3380_p11 }
  0x22   :  { %3390 = shalt.err (!%p3387_p1)
}
  0x23   :  { %s3490_s10 = smov 256   ;;  %s3491_s12 = smov 16  }
  0x24   :  { %67 = dma.hbm_to_vmem [thread:$0]  %s3688_s5, 16384, %s62_s22, [#allocation9], %s3490_s10, %s3490_s10, %s3491_s12  }
  0x25   :  { %s3391_s17 = scalar_lea.hbm %s3683_s0, 256 }
  0x26   :  { %p3392_p2 = scmp.ne.s32.totalorder %s3683_s0, %s3391_s17  ;;  %p3395_p3 = scmp.lt.u32.totalorder %s3391_s17, %s3683_s0 }
  0x28   :  { %p3397_p4 = pnand %p3395_p3, %p3392_p2 }
  0x2a   :  { %3400 = shalt.err (!%p3397_p4)
}
  0x2b   :  { %s3401_s23 = scalar_lea.vmem %s24_s24, 256  ;;  %p3406_p6 = scmp.lt.s32.totalorder %s24_s24, %s24_s24 }
  0x2c   :  { %p3402_p5 = scmp.ne.s32.totalorder %s24_s24, %s3401_s23  ;;  %p3407_p7 = scmp.lt.s32.totalorder %s3401_s23, %s3401_s23 }
  0x2e   :  { %p3408_p8 = por %p3407_p7, %p3406_p6 }
  0x30   :  { %p3409_p9 = pnand %p3408_p8, %p3402_p5 }
  0x32   :  { %3412 = shalt.err (!%p3409_p9)
}
  0x33   :  { %s3492_s5 = smov 128   ;;  %s3493_s22 = smov 8  }
  0x34   :  { %29 = dma.hbm_to_vmem [thread:$0]  %s3683_s0, 256, %s24_s24, [#allocation3], %s3492_s5, %s3492_s5, %s3493_s22  }
  0x35   :  { %s3494_s27 = smov [#allocation7]   ;;  %s3495_s29 = smov [#allocation10]  }
  0x36   :  { %s47_s28 = sshll.u32 %s3494_s27, 4  ;;  %s75_s30 = sshll.u32 %s3495_s29, 4  ;;  %s48_s28 = int_to_ptr.vmem [resolvable:$true] %s47_s28  ;;  %s76_s30 = int_to_ptr.vmem [resolvable:$true] %s75_s30 }
  0x37   :  { %s3413_s13 = scalar_lea.hbm %s3686_s3, 16384 }
  0x38   :  { %p3414_p10 = scmp.ne.s32.totalorder %s3686_s3, %s3413_s13  ;;  %p3417_p11 = scmp.lt.u32.totalorder %s3413_s13, %s3686_s3 }
  0x3a   :  { %p3419_p12 = pnand %p3417_p11, %p3414_p10 }
  0x3c   :  { %3422 = shalt.err (!%p3419_p12)
}
  0x3d   :  { %s3423_s0 = scalar_lea.vmem %s48_s28, 16384  ;;  %p3428_p0 = scmp.lt.s32.totalorder %s48_s28, %s48_s28 }
  0x3e   :  { %p3424_p13 = scmp.ne.s32.totalorder %s48_s28, %s3423_s0  ;;  %p3429_p1 = scmp.lt.s32.totalorder %s3423_s0, %s3423_s0 }
  0x40   :  { %p3430_p2 = por %p3429_p1, %p3428_p0 }
  0x42   :  { %p3431_p3 = pnand %p3430_p2, %p3424_p13 }
  0x44   :  { %3434 = shalt.err (!%p3431_p3)
}
  0x45   :  { %53 = dma.hbm_to_vmem [thread:$0]  %s3686_s3, 16384, %s48_s28, [#allocation6], %s3490_s10, %s3490_s10, %s3491_s12  }
  0x46   :  { %s3435_s21 = scalar_lea.hbm %s3690_s7, 4096 }
  0x47   :  { %p3436_p4 = scmp.ne.s32.totalorder %s3690_s7, %s3435_s21  ;;  %p3439_p5 = scmp.lt.u32.totalorder %s3435_s21, %s3690_s7 }
  0x49   :  { %p3441_p6 = pnand %p3439_p5, %p3436_p4 }
  0x4b   :  { %3444 = shalt.err (!%p3441_p6)
}
  0x4c   :  { %s3445_s29 = scalar_lea.vmem %s76_s30, 4096  ;;  %p3450_p8 = scmp.lt.s32.totalorder %s76_s30, %s76_s30 }
  0x4d   :  { %p3446_p7 = scmp.ne.s32.totalorder %s76_s30, %s3445_s29  ;;  %p3451_p9 = scmp.lt.s32.totalorder %s3445_s29, %s3445_s29 }
  0x4f   :  { %p3452_p10 = por %p3451_p9, %p3450_p8 }
  0x51   :  { %p3453_p11 = pnand %p3452_p10, %p3446_p7 }
  0x53   :  { %3456 = shalt.err (!%p3453_p11)
}
  0x54   :  { %s3496_s3 = smov 64   ;;  %s3497_s10 = smov 4  }
  0x55   :  { %81 = dma.hbm_to_vmem [thread:$0]  %s3690_s7, 4096, %s76_s30, [#allocation9], %s3496_s3, %s3496_s3, %s3497_s10  }
  0x56   :  { %3479 = dma.done.wait [#allocation3], 256  }
  0x57   :  { %3480 = vsyncadd [#allocation3], 4294967040 }
  0x58   :  { %3481 = dma.done.wait [#allocation6], 16512  }
  0x59   :  { %3482 = vsyncadd [#allocation6], 4294950784 }
  0x5a   :  { %3483 = dma.done.wait [#allocation9], 20480  }
  0x5b   :  { %3484 = vsyncadd [#allocation9], 4294946816  ;;  %v3498_v0 = vmov 1   ;;  %v3499_v1 = vmov 0   ;;  %v100_v2 = vld [vmem:[#allocation2] sm:$0xff]  ;;  %v101_v3 = vld [vmem:[#allocation2 + $0x8] sm:$0xff] }
  0x5c   :  { %2927 = vset.pattern.permute.xlu1 %v3498_v0  ;;  %2926 = vset.pattern.permute.xlu0 %v3499_v1  ;;  %v2929_v4 = vld [vmem:[#allocation7 + $0x4] ss:$16 sps:$4 sm:$0xff]   ;;  %v2931_v5 = vld [vmem:[#allocation7 + $0xc] ss:$16 sps:$4 sm:$0xff]   ;;  %v2933_v6 = vld [vmem:[#allocation7] ss:$16 sps:$4 sm:$0xff]  }
  0x5d   :  { %145 = vperm.xlu1 %2927, %v100_v2   ;;  %105 = vperm.xlu0 %2926, %v100_v2   ;;  %v2934_v7 = vld [vmem:[#allocation7 + $0x8] ss:$16 sps:$4 sm:$0xff]   ;;  %v2935_v8 = vld [vmem:[#allocation7 + $0x24] ss:$16 sps:$4 sm:$0xff]   ;;  %v2937_v9 = vld [vmem:[#allocation7 + $0x2c] ss:$16 sps:$4 sm:$0xff]  }
  0x5e   :  { %1021 = vmatprep.subr.bf16.mxu0 %v2929_v4  ;;  %1107 = vmatprep.subr.bf16.mxu1 %v2931_v5  ;;  %v2939_v10 = vld [vmem:[#allocation7 + $0x20] ss:$16 sps:$4 sm:$0xff]   ;;  %v2940_v11 = vld [vmem:[#allocation7 + $0x28] ss:$16 sps:$4 sm:$0xff]   ;;  %v2941_v12 = vld [vmem:[#allocation7 + $0x44] ss:$16 sps:$4 sm:$0xff]  }
  0x5f   :  { %1022 = vmatpush1.bf16.msra.mxu0 %v2933_v6  ;;  %1108 = vmatpush1.bf16.msra.mxu1 %v2934_v7  ;;  %v2943_v13 = vld [vmem:[#allocation7 + $0x4c] ss:$16 sps:$4 sm:$0xff]   ;;  %v2945_v14 = vld [vmem:[#allocation7 + $0x40] ss:$16 sps:$4 sm:$0xff]   ;;  %v2947_v15 = vld [vmem:[#allocation7 + $0x64] ss:$16 sps:$4 sm:$0xff]   ;;  %v114_v6 = vlaneseq }
  0x60   :  { %1023 = vmatprep.subr.bf16.mxu0 %v2935_v8  ;;  %1109 = vmatprep.subr.bf16.mxu1 %v2937_v9  ;;  %v2946_v16 = vld [vmem:[#allocation7 + $0x48] ss:$16 sps:$4 sm:$0xff]   ;;  %v2949_v17 = vld [vmem:[#allocation7 + $0x6c] ss:$16 sps:$4 sm:$0xff]   ;;  %v2951_v18 = vld [vmem:[#allocation7 + $0x60] ss:$16 sps:$4 sm:$0xff]  }
  0x61   :  { %149 = vperm.xlu1 %2927, %v101_v3   ;;  %110 = vperm.xlu0 %2926, %v101_v3   ;;  %v2953_v19 = vld [vmem:[#allocation7 + $0x84] ss:$16 sps:$4 sm:$0xff]   ;;  %v2952_v20 = vld [vmem:[#allocation7 + $0x68] ss:$16 sps:$4 sm:$0xff]   ;;  %v2955_v21 = vld [vmem:[#allocation7 + $0x8c] ss:$16 sps:$4 sm:$0xff]  }
  0x62   :  { %v2957_v22 = vld [vmem:[#allocation7 + $0x80] ss:$16 sps:$4 sm:$0xff]   ;;  %v2959_v23 = vld [vmem:[#allocation7 + $0xa4] ss:$16 sps:$4 sm:$0xff]   ;;  %v2958_v24 = vld [vmem:[#allocation7 + $0x88] ss:$16 sps:$4 sm:$0xff]  }
  0x63   :  { %1024 = vmatpush1.bf16.msra.mxu0 %v2939_v10  ;;  %1110 = vmatpush1.bf16.msra.mxu1 %v2940_v11  ;;  %v2961_v25 = vld [vmem:[#allocation7 + $0xac] ss:$16 sps:$4 sm:$0xff]   ;;  %v2963_v26 = vld [vmem:[#allocation7 + $0xa0] ss:$16 sps:$4 sm:$0xff]   ;;  %v2965_v27 = vld [vmem:[#allocation7 + $0xc4] ss:$16 sps:$4 sm:$0xff]  }
  0x64   :  { %1025 = vmatprep.subr.bf16.mxu0 %v2941_v12  ;;  %1111 = vmatprep.subr.bf16.mxu1 %v2943_v13  ;;  %v2964_v28 = vld [vmem:[#allocation7 + $0xa8] ss:$16 sps:$4 sm:$0xff]   ;;  %v2967_v29 = vld [vmem:[#allocation7 + $0xcc] ss:$16 sps:$4 sm:$0xff]   ;;  %v2969_v30 = vld [vmem:[#allocation7 + $0xc0] ss:$16 sps:$4 sm:$0xff]  }
  0x65   :  { %2928 = vset.pattern.permute.xlu0 %v3498_v0  ;;  %v2971_v31 = vld [vmem:[#allocation7 + $0xe4] ss:$16 sps:$4 sm:$0xff]   ;;  %v2970_v32 = vld [vmem:[#allocation7 + $0xc8] ss:$16 sps:$4 sm:$0xff]   ;;  %v2973_v33 = vld [vmem:[#allocation7 + $0xec] ss:$16 sps:$4 sm:$0xff]  }
  0x66   :  { %v2975_v34 = vld [vmem:[#allocation7 + $0xe0] ss:$16 sps:$4 sm:$0xff]   ;;  %v2977_v35 = vld [vmem:[#allocation7 + $0x104] ss:$16 sps:$4 sm:$0xff]   ;;  %v2976_v36 = vld [vmem:[#allocation7 + $0xe8] ss:$16 sps:$4 sm:$0xff]  }
  0x67   :  { %1026 = vmatpush1.bf16.msra.mxu0 %v2945_v14  ;;  %1112 = vmatpush1.bf16.msra.mxu1 %v2946_v16  ;;  %v2979_v37 = vld [vmem:[#allocation7 + $0x10c] ss:$16 sps:$4 sm:$0xff]   ;;  %v2981_v38 = vld [vmem:[#allocation7 + $0x100] ss:$16 sps:$4 sm:$0xff]   ;;  %v2983_v39 = vld [vmem:[#allocation7 + $0x124] ss:$16 sps:$4 sm:$0xff]  }
  0x68   :  { %1027 = vmatprep.subr.bf16.mxu0 %v2947_v15  ;;  %1113 = vmatprep.subr.bf16.mxu1 %v2949_v17  ;;  %v2982_v40 = vld [vmem:[#allocation7 + $0x108] ss:$16 sps:$4 sm:$0xff]   ;;  %v2985_v41 = vld [vmem:[#allocation7 + $0x12c] ss:$16 sps:$4 sm:$0xff]   ;;  %v2987_v42 = vld [vmem:[#allocation7 + $0x120] ss:$16 sps:$4 sm:$0xff]  }
  0x69   :  { %v2989_v43 = vld [vmem:[#allocation7 + $0x144] ss:$16 sps:$4 sm:$0xff]   ;;  %v2988_v44 = vld [vmem:[#allocation7 + $0x128] ss:$16 sps:$4 sm:$0xff]   ;;  %v2991_v45 = vld [vmem:[#allocation7 + $0x14c] ss:$16 sps:$4 sm:$0xff]  }
  0x6a   :  { %v2993_v46 = vld [vmem:[#allocation7 + $0x140] ss:$16 sps:$4 sm:$0xff]   ;;  %v2995_v47 = vld [vmem:[#allocation7 + $0x164] ss:$16 sps:$4 sm:$0xff]   ;;  %v2994_v48 = vld [vmem:[#allocation7 + $0x148] ss:$16 sps:$4 sm:$0xff]  }
  0x6b   :  { %1028 = vmatpush1.bf16.msra.mxu0 %v2951_v18  ;;  %1114 = vmatpush1.bf16.msra.mxu1 %v2952_v20  ;;  %v2997_v49 = vld [vmem:[#allocation7 + $0x16c] ss:$16 sps:$4 sm:$0xff]   ;;  %v2999_v50 = vld [vmem:[#allocation7 + $0x160] ss:$16 sps:$4 sm:$0xff]   ;;  %v3001_v51 = vld [vmem:[#allocation7 + $0x184] ss:$16 sps:$4 sm:$0xff]  }
  0x6c   :  { %1029 = vmatprep.subr.bf16.mxu0 %v2953_v19  ;;  %1115 = vmatprep.subr.bf16.mxu1 %v2955_v21  ;;  %v3000_v52 = vld [vmem:[#allocation7 + $0x168] ss:$16 sps:$4 sm:$0xff]   ;;  %v3003_v53 = vld [vmem:[#allocation7 + $0x18c] ss:$16 sps:$4 sm:$0xff]   ;;  %v3005_v54 = vld [vmem:[#allocation7 + $0x180] ss:$16 sps:$4 sm:$0xff]  }
  0x6d   :  { %v3007_v55 = vld [vmem:[#allocation7 + $0x1a4] ss:$16 sps:$4 sm:$0xff]   ;;  %v3006_v56 = vld [vmem:[#allocation7 + $0x188] ss:$16 sps:$4 sm:$0xff]   ;;  %v3009_v57 = vld [vmem:[#allocation7 + $0x1ac] ss:$16 sps:$4 sm:$0xff]  }
  0x6e   :  { %v3011_v58 = vld [vmem:[#allocation7 + $0x1a0] ss:$16 sps:$4 sm:$0xff]   ;;  %v3013_v59 = vld [vmem:[#allocation7 + $0x1c4] ss:$16 sps:$4 sm:$0xff]   ;;  %v3012_v60 = vld [vmem:[#allocation7 + $0x1a8] ss:$16 sps:$4 sm:$0xff]  }
  0x6f   :  { %1030 = vmatpush1.bf16.msra.mxu0 %v2957_v22  ;;  %1116 = vmatpush1.bf16.msra.mxu1 %v2958_v24  ;;  %v3015_v61 = vld [vmem:[#allocation7 + $0x1cc] ss:$16 sps:$4 sm:$0xff]   ;;  %v3017_v62 = vld [vmem:[#allocation7 + $0x1c0] ss:$16 sps:$4 sm:$0xff]   ;;  %v3019_v63 = vld [vmem:[#allocation7 + $0x1e4] ss:$16 sps:$4 sm:$0xff]  }
  0x70   :  { %1031 = vmatprep.subr.bf16.mxu0 %v2959_v23  ;;  %1117 = vmatprep.subr.bf16.mxu1 %v2961_v25  ;;  %v3018_v0 = vld [vmem:[#allocation7 + $0x1c8] ss:$16 sps:$4 sm:$0xff]   ;;  %v3021_v1 = vld [vmem:[#allocation7 + $0x1ec] ss:$16 sps:$4 sm:$0xff]   ;;  %v3023_v2 = vld [vmem:[#allocation7 + $0x1e0] ss:$16 sps:$4 sm:$0xff]  }
  0x71   :  { %v3027_v3 = vld [vmem:[#allocation7 + $0x204] ss:$16 sps:$4 sm:$0xff]   ;;  %v3024_v4 = vld [vmem:[#allocation7 + $0x1e8] ss:$16 sps:$4 sm:$0xff]   ;;  %v3030_v5 = vld [vmem:[#allocation7 + $0x20c] ss:$16 sps:$4 sm:$0xff]  }
  0x72   :  { %v115_v7 = vshrl.u32 %v114_v6, 7  ;;  %v143_v11 = vld [vmem:[#allocation5 + $0x1] ss:$2 sm:$0xf]  ;;  %v189_v22 = vld [vmem:[%s3685_s2] sm:$0xf] }
  0x73   :  { %1032 = vmatpush1.bf16.msra.mxu0 %v2963_v26  ;;  %1118 = vmatpush1.bf16.msra.mxu1 %v2964_v28  ;;  %v102_v13 = vld [vmem:[#allocation5] ss:$2 sm:$0xf]  ;;  %s3500_s14 = smov [#allocation11]  }
  0x74   :  { %1033 = vmatprep.subr.bf16.mxu0 %v2965_v27  ;;  %1119 = vmatprep.subr.bf16.mxu1 %v2967_v29  ;;  %v3620_v8 = vsub.s32 0, %v115_v7  ;;  %v3622_v9 = vsub.s32 1, %v115_v7  ;;  %v3624_v10 = vsub.s32 2, %v115_v7  ;;  %v3626_v12 = vsub.s32 3, %v115_v7  ;;  %s2533_s15 = sshll.u32 %s3500_s14, 4  ;;  %s2534_s15 = int_to_ptr.vmem [resolvable:$true] %s2533_s15 }
  0x75   :  { %p3462_p13 = scmp.lt.s32.totalorder %s2534_s15, %s2534_s15 }
  0x76   :  { %v156_v14 = vrot.slane %v143_v11, %v3620_v8  ;;  %v160_v15 = vrot.slane %v143_v11, %v3622_v9  ;;  %v164_v16 = vrot.slane %v143_v11, %v3624_v10  ;;  %v117_v17 = vrot.slane %v102_v13, %v3620_v8 }
  0x77   :  { %1034 = vmatpush1.bf16.msra.mxu0 %v2969_v30  ;;  %1120 = vmatpush1.bf16.msra.mxu1 %v2970_v32  ;;  %v121_v18 = vrot.slane %v102_v13, %v3622_v9  ;;  %v125_v19 = vrot.slane %v102_v13, %v3624_v10  ;;  %v168_v20 = vrot.slane %v143_v11, %v3626_v12 }
  0x78   :  { %1035 = vmatprep.subr.bf16.mxu0 %v2971_v31  ;;  %1121 = vmatprep.subr.bf16.mxu1 %v2973_v33  ;;  %v129_v21 = vrot.slane %v102_v13, %v3626_v12  ;;  %v202_v31 = vrot.slane %v189_v22, %v3624_v10 }
  0x7b   :  { %1036 = vmatpush1.bf16.msra.mxu0 %v2975_v34  ;;  %1122 = vmatpush1.bf16.msra.mxu1 %v2976_v36  ;;  %v198_v34 = vrot.slane %v189_v22, %v3622_v9 }
  0x7c   :  { %1037 = vmatprep.subr.bf16.mxu0 %v2977_v35  ;;  %1123 = vmatprep.subr.bf16.mxu1 %v2979_v37  ;;  %v194_v35 = vrot.slane %v189_v22, %v3620_v8 }
  0x7f   :  { %1038 = vmatpush1.bf16.msra.mxu0 %v2981_v38  ;;  %1124 = vmatpush1.bf16.msra.mxu1 %v2982_v40 }
  0x80   :  { %1039 = vmatprep.subr.bf16.mxu0 %v2983_v39  ;;  %1125 = vmatprep.subr.bf16.mxu1 %v2985_v41  ;;  %v206_v41 = vrot.slane %v189_v22, %v3626_v12  ;;  %v3042_v22 = vld [vmem:[#allocation7 + $0x24c] ss:$16 sps:$4 sm:$0xff]  }
  0x83   :  { %1040 = vmatpush1.bf16.msra.mxu0 %v2987_v42  ;;  %1126 = vmatpush1.bf16.msra.mxu1 %v2988_v44 }
  0x84   :  { %1041 = vmatprep.subr.bf16.mxu0 %v2989_v43  ;;  %1127 = vmatprep.subr.bf16.mxu1 %v2991_v45 }
  0x87   :  { %1042 = vmatpush1.bf16.msra.mxu0 %v2993_v46  ;;  %1128 = vmatpush1.bf16.msra.mxu1 %v2994_v48 }
  0x88   :  { %1043 = vmatprep.subr.bf16.mxu0 %v2995_v47  ;;  %1129 = vmatprep.subr.bf16.mxu1 %v2997_v49 }
  0x8b   :  { %1044 = vmatpush1.bf16.msra.mxu0 %v2999_v50  ;;  %1130 = vmatpush1.bf16.msra.mxu1 %v3000_v52 }
  0x8c   :  { %1045 = vmatprep.subr.bf16.mxu0 %v3001_v51  ;;  %1131 = vmatprep.subr.bf16.mxu1 %v3003_v53 }
  0x8f   :  { %1046 = vmatpush1.bf16.msra.mxu0 %v3005_v54  ;;  %1132 = vmatpush1.bf16.msra.mxu1 %v3006_v56 }
  0x90   :  { %1047 = vmatprep.subr.bf16.mxu0 %v3007_v55  ;;  %1133 = vmatprep.subr.bf16.mxu1 %v3009_v57 }
  0x93   :  { %1048 = vmatpush1.bf16.msra.mxu0 %v3011_v58  ;;  %1134 = vmatpush1.bf16.msra.mxu1 %v3012_v60 }
  0x94   :  { %1049 = vmatprep.subr.bf16.mxu0 %v3013_v59  ;;  %1135 = vmatprep.subr.bf16.mxu1 %v3015_v61 }
  0x97   :  { %1050 = vmatpush1.bf16.msra.mxu0 %v3017_v62  ;;  %1136 = vmatpush1.bf16.msra.mxu1 %v3018_v0 }
  0x98   :  { %1051 = vmatprep.subr.bf16.mxu0 %v3019_v63  ;;  %1137 = vmatprep.subr.bf16.mxu1 %v3021_v1 }
  0x9b   :  { %1052 = vmatpush1.bf16.msra.mxu0 %v3023_v2  ;;  %1138 = vmatpush1.bf16.msra.mxu1 %v3024_v4  ;;  %v3028_v4 = vld [vmem:[#allocation7 + $0x208] ss:$16 sps:$4 sm:$0xff]  }
  0x9c   :  { %1064 = vmatprep.subr.bf16.mxu0 %v3027_v3  ;;  %1150 = vmatprep.subr.bf16.mxu1 %v3030_v5  ;;  %v3025_v3 = vld [vmem:[#allocation7 + $0x200] ss:$16 sps:$4 sm:$0xff]  }
  0xdc   :  { %v146_v23 = vpop.permute.xlu1 %145  ;;  %v106_v24 = vpop.permute.xlu0 %105 }
  0xdd   :  { %v173_v25 = vmul.f32 %v156_v14, %v146_v23  ;;  %v174_v26 = vmul.f32 %v160_v15, %v146_v23  ;;  %v175_v27 = vmul.f32 %v164_v16, %v146_v23  ;;  %v134_v28 = vmul.f32 %v117_v17, %v106_v24 }
  0xde   :  { %v135_v29 = vmul.f32 %v121_v18, %v106_v24  ;;  %v136_v30 = vmul.f32 %v125_v19, %v106_v24  ;;  %v176_v32 = vmul.f32 %v168_v20, %v146_v23  ;;  %v137_v33 = vmul.f32 %v129_v21, %v106_v24  ;;  %v3037_v23 = vld [vmem:[#allocation7 + $0x240] ss:$16 sps:$4 sm:$0xff]   ;;  %v3040_v24 = vld [vmem:[#allocation7 + $0x248] ss:$16 sps:$4 sm:$0xff]  }
  0xdf   :  { %v181_v40 = vadd.f32 %v173_v25, %v134_v28  ;;  %v3045_v25 = vld [vmem:[#allocation7 + $0x264] ss:$16 sps:$4 sm:$0xff]   ;;  %v3046_v28 = vld [vmem:[#allocation7 + $0x268] ss:$16 sps:$4 sm:$0xff]  }
  0xe0   :  { %v150_v36 = vpop.permute.xlu1 %149  ;;  %v183_v37 = vadd.f32 %v175_v27, %v136_v30  ;;  %v111_v38 = vpop.permute.xlu0 %110  ;;  %v182_v39 = vadd.f32 %v174_v26, %v135_v29  ;;  %v184_v52 = vadd.f32 %v176_v32, %v137_v33  ;;  %v3048_v26 = vld [vmem:[#allocation7 + $0x26c] ss:$16 sps:$4 sm:$0xff]   ;;  %v3043_v27 = vld [vmem:[#allocation7 + $0x260] ss:$16 sps:$4 sm:$0xff]   ;;  %v3051_v29 = vld [vmem:[#allocation7 + $0x284] ss:$16 sps:$4 sm:$0xff]  }
  0xe1   :  { %v177_v42 = vmul.f32 %v156_v14, %v150_v36  ;;  %v178_v43 = vmul.f32 %v160_v15, %v150_v36  ;;  %v179_v44 = vmul.f32 %v164_v16, %v150_v36  ;;  %v180_v45 = vmul.f32 %v168_v20, %v150_v36  ;;  %v3033_v14 = vld [vmem:[#allocation7 + $0x224] ss:$16 sps:$4 sm:$0xff]   ;;  %v3036_v15 = vld [vmem:[#allocation7 + $0x22c] ss:$16 sps:$4 sm:$0xff]   ;;  %v3052_v32 = vld [vmem:[#allocation7 + $0x288] ss:$16 sps:$4 sm:$0xff]  }
  0xe2   :  { %v138_v46 = vmul.f32 %v117_v17, %v111_v38  ;;  %v139_v47 = vmul.f32 %v121_v18, %v111_v38  ;;  %v140_v48 = vmul.f32 %v125_v19, %v111_v38  ;;  %v141_v49 = vmul.f32 %v129_v21, %v111_v38  ;;  %v3031_v18 = vld [vmem:[#allocation7 + $0x220] ss:$16 sps:$4 sm:$0xff]   ;;  %v3034_v19 = vld [vmem:[#allocation7 + $0x228] ss:$16 sps:$4 sm:$0xff]   ;;  %v3039_v21 = vld [vmem:[#allocation7 + $0x244] ss:$16 sps:$4 sm:$0xff]  }
  0xe3   :  { %v212_v50 = vadd.f32 %v198_v34, %v182_v39  ;;  %v211_v51 = vadd.f32 %v194_v35, %v181_v40  ;;  %v213_v53 = vadd.f32 %v202_v31, %v183_v37  ;;  %v214_v0 = vadd.f32 %v206_v41, %v184_v52  ;;  %v3054_v30 = vld [vmem:[#allocation7 + $0x28c] ss:$16 sps:$4 sm:$0xff]   ;;  %v3057_v33 = vld [vmem:[#allocation7 + $0x2a4] ss:$16 sps:$4 sm:$0xff]   ;;  %v3058_v36 = vld [vmem:[#allocation7 + $0x2a8] ss:$16 sps:$4 sm:$0xff]  }
  0xe4   :  { %v185_v54 = vadd.f32 %v177_v42, %v138_v46  ;;  %v186_v55 = vadd.f32 %v178_v43, %v139_v47  ;;  %v187_v56 = vadd.f32 %v179_v44, %v140_v48  ;;  %v188_v57 = vadd.f32 %v180_v45, %v141_v49  ;;  %v3063_v37 = vld [vmem:[#allocation7 + $0x2c4] ss:$16 sps:$4 sm:$0xff]   ;;  %v3066_v38 = vld [vmem:[#allocation7 + $0x2cc] ss:$16 sps:$4 sm:$0xff]   ;;  %v3061_v39 = vld [vmem:[#allocation7 + $0x2c0] ss:$16 sps:$4 sm:$0xff]  }
  0xe5   :  { %v220_v62 = vmax.f32 %v212_v50, 0.0  ;;  %v219_v63 = vmax.f32 %v211_v51, 0.0  ;;  %v221_v6 = vmax.f32 %v213_v53, 0.0  ;;  %v222_v17 = vmax.f32 %v214_v0, 0.0  ;;  %v3064_v40 = vld [vmem:[#allocation7 + $0x2c8] ss:$16 sps:$4 sm:$0xff]  }
  0xe6   :  { %v217_v58 = vadd.f32 %v202_v31, %v187_v56  ;;  %v216_v59 = vadd.f32 %v198_v34, %v186_v55  ;;  %v215_v60 = vadd.f32 %v194_v35, %v185_v54  ;;  %v218_v61 = vadd.f32 %v206_v41, %v188_v57  ;;  %v3049_v31 = vld [vmem:[#allocation7 + $0x280] ss:$16 sps:$4 sm:$0xff]   ;;  %v3060_v34 = vld [vmem:[#allocation7 + $0x2ac] ss:$16 sps:$4 sm:$0xff]   ;;  %v3069_v41 = vld [vmem:[#allocation7 + $0x2e4] ss:$16 sps:$4 sm:$0xff]  }
  0xe7   :  { %v3055_v35 = vld [vmem:[#allocation7 + $0x2a0] ss:$16 sps:$4 sm:$0xff]   ;;  %v3072_v42 = vld [vmem:[#allocation7 + $0x2ec] ss:$16 sps:$4 sm:$0xff]   ;;  %v3070_v44 = vld [vmem:[#allocation7 + $0x2e8] ss:$16 sps:$4 sm:$0xff]  }
  0xe8   :  { %v225_v1 = vmax.f32 %v217_v58, 0.0  ;;  %v224_v2 = vmax.f32 %v216_v59, 0.0  ;;  %v223_v5 = vmax.f32 %v215_v60, 0.0  ;;  %v226_v7 = vmax.f32 %v218_v61, 0.0  ;;  %v3067_v43 = vld [vmem:[#allocation7 + $0x2e0] ss:$16 sps:$4 sm:$0xff]  }
  0xe9   :  { %v3075_v45 = vld [vmem:[#allocation7 + $0x304] ss:$16 sps:$4 sm:$0xff]   ;;  %v3078_v46 = vld [vmem:[#allocation7 + $0x30c] ss:$16 sps:$4 sm:$0xff]   ;;  %v3073_v47 = vld [vmem:[#allocation7 + $0x300] ss:$16 sps:$4 sm:$0xff]  }
  0xea   :  { %v228_v11 = vpack.c.bf16 %v224_v2, %v220_v62  ;;  %v227_v13 = vpack.c.bf16 %v223_v5, %v219_v63  ;;  %v3643_v16 = vpack.c.bf16 %v225_v1, %v221_v6  ;;  %v230_v20 = vpack.c.bf16 %v226_v7, %v222_v17  ;;  %v3076_v48 = vld [vmem:[#allocation7 + $0x308] ss:$16 sps:$4 sm:$0xff]   ;;  %v3081_v49 = vld [vmem:[#allocation7 + $0x324] ss:$16 sps:$4 sm:$0xff]   ;;  %v3084_v50 = vld [vmem:[#allocation7 + $0x32c] ss:$16 sps:$4 sm:$0xff]  }
  0xeb   :  { %v3079_v51 = vld [vmem:[#allocation7 + $0x320] ss:$16 sps:$4 sm:$0xff]   ;;  %v3082_v52 = vld [vmem:[#allocation7 + $0x328] ss:$16 sps:$4 sm:$0xff]   ;;  %v3087_v53 = vld [vmem:[#allocation7 + $0x344] ss:$16 sps:$4 sm:$0xff]  }
  0xec   :  { %1053 = vmatprep.mubr.bf16.mxu0 %v228_v11  ;;  %1139 = vmatprep.mubr.bf16.mxu1 %v228_v11  ;;  %v3090_v54 = vld [vmem:[#allocation7 + $0x34c] ss:$16 sps:$4 sm:$0xff]   ;;  %v3085_v55 = vld [vmem:[#allocation7 + $0x340] ss:$16 sps:$4 sm:$0xff]   ;;  %v3088_v56 = vld [vmem:[#allocation7 + $0x348] ss:$16 sps:$4 sm:$0xff]  }
  0xed   :  { %1054 = vmatmul.mubr.bf16.vlgmr.msra.gmra.mrb[0].mxu0 %v227_v13  ;;  %1140 = vmatmul.mubr.bf16.vlgmr.msra.gmra.mrb[0].mxu1 %v227_v13  ;;  %v3093_v57 = vld [vmem:[#allocation7 + $0x364] ss:$16 sps:$4 sm:$0xff]   ;;  %v3096_v58 = vld [vmem:[#allocation7 + $0x36c] ss:$16 sps:$4 sm:$0xff]   ;;  %v3091_v59 = vld [vmem:[#allocation7 + $0x360] ss:$16 sps:$4 sm:$0xff]  }
  0xee   :  { %1065 = vmatpush1.bf16.msra.mxu0 %v3025_v3  ;;  %1151 = vmatpush1.bf16.msra.mxu1 %v3028_v4  ;;  %v3094_v60 = vld [vmem:[#allocation7 + $0x368] ss:$16 sps:$4 sm:$0xff]   ;;  %v3099_v61 = vld [vmem:[#allocation7 + $0x384] ss:$16 sps:$4 sm:$0xff]   ;;  %v3102_v62 = vld [vmem:[#allocation7 + $0x38c] ss:$16 sps:$4 sm:$0xff]  }
  0xef   :  { %1096 = vmatprep.mubr.bf16.mxu0 %v230_v20  ;;  %1182 = vmatprep.mubr.bf16.mxu1 %v230_v20  ;;  %v3097_v63 = vld [vmem:[#allocation7 + $0x380] ss:$16 sps:$4 sm:$0xff]   ;;  %v3100_v0 = vld [vmem:[#allocation7 + $0x388] ss:$16 sps:$4 sm:$0xff]   ;;  %v3105_v1 = vld [vmem:[#allocation7 + $0x3a4] ss:$16 sps:$4 sm:$0xff]  }
  0xf0   :  { %1066 = vmatprep.subr.bf16.mxu0 %v3033_v14  ;;  %1152 = vmatprep.subr.bf16.mxu1 %v3036_v15  ;;  %v3108_v2 = vld [vmem:[#allocation7 + $0x3ac] ss:$16 sps:$4 sm:$0xff]   ;;  %v3103_v3 = vld [vmem:[#allocation7 + $0x3a0] ss:$16 sps:$4 sm:$0xff]   ;;  %v3106_v4 = vld [vmem:[#allocation7 + $0x3a8] ss:$16 sps:$4 sm:$0xff]  }
  0xf1   :  { %v3111_v5 = vld [vmem:[#allocation7 + $0x3c4] ss:$16 sps:$4 sm:$0xff]   ;;  %v3114_v6 = vld [vmem:[#allocation7 + $0x3cc] ss:$16 sps:$4 sm:$0xff]   ;;  %v3109_v7 = vld [vmem:[#allocation7 + $0x3c0] ss:$16 sps:$4 sm:$0xff]  }
  0xf2   :  { %1067 = vmatpush1.bf16.msra.mxu0 %v3031_v18  ;;  %1153 = vmatpush1.bf16.msra.mxu1 %v3034_v19  ;;  %v3112_v11 = vld [vmem:[#allocation7 + $0x3c8] ss:$16 sps:$4 sm:$0xff]   ;;  %v3117_v13 = vld [vmem:[#allocation7 + $0x3e4] ss:$16 sps:$4 sm:$0xff]   ;;  %v3120_v14 = vld [vmem:[#allocation7 + $0x3ec] ss:$16 sps:$4 sm:$0xff]  }
  0xf3   :  { %1068 = vmatprep.subr.bf16.mxu0 %v3039_v21  ;;  %1154 = vmatprep.subr.bf16.mxu1 %v3042_v22  ;;  %v3115_v15 = vld [vmem:[#allocation7 + $0x3e0] ss:$16 sps:$4 sm:$0xff]   ;;  %v3118_v17 = vld [vmem:[#allocation7 + $0x3e8] ss:$16 sps:$4 sm:$0xff]   ;;  %v3123_v18 = vld [vmem:[#allocation8 + $0x4] ss:$16 sps:$4 sm:$0xff]  }
  0xf4   :  { %v3126_v19 = vld [vmem:[#allocation8 + $0xc] ss:$16 sps:$4 sm:$0xff]   ;;  %v3121_v20 = vld [vmem:[#allocation8] ss:$16 sps:$4 sm:$0xff]   ;;  %v3124_v21 = vld [vmem:[#allocation8 + $0x8] ss:$16 sps:$4 sm:$0xff]  }
  0xf5   :  { %v3129_v22 = vld [vmem:[#allocation8 + $0x24] ss:$16 sps:$4 sm:$0xff]  }
  0xf6   :  { %1069 = vmatpush1.bf16.msra.mxu0 %v3037_v23  ;;  %1155 = vmatpush1.bf16.msra.mxu1 %v3040_v24  ;;  %v3132_v23 = vld [vmem:[#allocation8 + $0x2c] ss:$16 sps:$4 sm:$0xff]   ;;  %v3127_v24 = vld [vmem:[#allocation8 + $0x20] ss:$16 sps:$4 sm:$0xff]  }
  0xf7   :  { %1070 = vmatprep.subr.bf16.mxu0 %v3045_v25  ;;  %1156 = vmatprep.subr.bf16.mxu1 %v3048_v26  ;;  %v3130_v25 = vld [vmem:[#allocation8 + $0x28] ss:$16 sps:$4 sm:$0xff]   ;;  %v3135_v26 = vld [vmem:[#allocation8 + $0x44] ss:$16 sps:$4 sm:$0xff]  }
  0xfa   :  { %1071 = vmatpush1.bf16.msra.mxu0 %v3043_v27  ;;  %1157 = vmatpush1.bf16.msra.mxu1 %v3046_v28  ;;  %v3138_v27 = vld [vmem:[#allocation8 + $0x4c] ss:$16 sps:$4 sm:$0xff]   ;;  %v3133_v28 = vld [vmem:[#allocation8 + $0x40] ss:$16 sps:$4 sm:$0xff]  }
  0xfb   :  { %1072 = vmatprep.subr.bf16.mxu0 %v3051_v29  ;;  %1158 = vmatprep.subr.bf16.mxu1 %v3054_v30  ;;  %v3136_v29 = vld [vmem:[#allocation8 + $0x48] ss:$16 sps:$4 sm:$0xff]   ;;  %v3141_v30 = vld [vmem:[#allocation8 + $0x64] ss:$16 sps:$4 sm:$0xff]  }
  0xfe   :  { %1073 = vmatpush1.bf16.msra.mxu0 %v3049_v31  ;;  %1159 = vmatpush1.bf16.msra.mxu1 %v3052_v32  ;;  %v3144_v31 = vld [vmem:[#allocation8 + $0x6c] ss:$16 sps:$4 sm:$0xff]   ;;  %v3139_v32 = vld [vmem:[#allocation8 + $0x60] ss:$16 sps:$4 sm:$0xff]  }
  0xff   :  { %1074 = vmatprep.subr.bf16.mxu0 %v3057_v33  ;;  %1160 = vmatprep.subr.bf16.mxu1 %v3060_v34  ;;  %v3147_v33 = vld [vmem:[#allocation8 + $0x84] ss:$16 sps:$4 sm:$0xff]   ;;  %v3150_v34 = vld [vmem:[#allocation8 + $0x8c] ss:$16 sps:$4 sm:$0xff]  }
 0x102   :  { %1075 = vmatpush1.bf16.msra.mxu0 %v3055_v35  ;;  %1161 = vmatpush1.bf16.msra.mxu1 %v3058_v36  ;;  %v3145_v35 = vld [vmem:[#allocation8 + $0x80] ss:$16 sps:$4 sm:$0xff]   ;;  %v3148_v36 = vld [vmem:[#allocation8 + $0x88] ss:$16 sps:$4 sm:$0xff]  }
 0x103   :  { %1076 = vmatprep.subr.bf16.mxu0 %v3063_v37  ;;  %1162 = vmatprep.subr.bf16.mxu1 %v3066_v38  ;;  %v3153_v37 = vld [vmem:[#allocation8 + $0xa4] ss:$16 sps:$4 sm:$0xff]   ;;  %v3156_v38 = vld [vmem:[#allocation8 + $0xac] ss:$16 sps:$4 sm:$0xff]  }
 0x106   :  { %1077 = vmatpush1.bf16.msra.mxu0 %v3061_v39  ;;  %1163 = vmatpush1.bf16.msra.mxu1 %v3064_v40  ;;  %v3151_v39 = vld [vmem:[#allocation8 + $0xa0] ss:$16 sps:$4 sm:$0xff]   ;;  %v3154_v40 = vld [vmem:[#allocation8 + $0xa8] ss:$16 sps:$4 sm:$0xff]  }
 0x107   :  { %1078 = vmatprep.subr.bf16.mxu0 %v3069_v41  ;;  %1164 = vmatprep.subr.bf16.mxu1 %v3072_v42  ;;  %v3159_v41 = vld [vmem:[#allocation8 + $0xc4] ss:$16 sps:$4 sm:$0xff]   ;;  %v3162_v42 = vld [vmem:[#allocation8 + $0xcc] ss:$16 sps:$4 sm:$0xff]  }
 0x10a   :  { %1079 = vmatpush1.bf16.msra.mxu0 %v3067_v43  ;;  %1165 = vmatpush1.bf16.msra.mxu1 %v3070_v44  ;;  %v3157_v43 = vld [vmem:[#allocation8 + $0xc0] ss:$16 sps:$4 sm:$0xff]   ;;  %v3160_v44 = vld [vmem:[#allocation8 + $0xc8] ss:$16 sps:$4 sm:$0xff]  }
 0x10b   :  { %1080 = vmatprep.subr.bf16.mxu0 %v3075_v45  ;;  %1166 = vmatprep.subr.bf16.mxu1 %v3078_v46  ;;  %v3165_v45 = vld [vmem:[#allocation8 + $0xe4] ss:$16 sps:$4 sm:$0xff]   ;;  %v3168_v46 = vld [vmem:[#allocation8 + $0xec] ss:$16 sps:$4 sm:$0xff]  }
 0x10e   :  { %1081 = vmatpush1.bf16.msra.mxu0 %v3073_v47  ;;  %1167 = vmatpush1.bf16.msra.mxu1 %v3076_v48  ;;  %v3163_v47 = vld [vmem:[#allocation8 + $0xe0] ss:$16 sps:$4 sm:$0xff]   ;;  %v3166_v48 = vld [vmem:[#allocation8 + $0xe8] ss:$16 sps:$4 sm:$0xff]  }
 0x10f   :  { %1082 = vmatprep.subr.bf16.mxu0 %v3081_v49  ;;  %1168 = vmatprep.subr.bf16.mxu1 %v3084_v50  ;;  %v3171_v49 = vld [vmem:[#allocation8 + $0x104] ss:$16 sps:$4 sm:$0xff]   ;;  %v3174_v50 = vld [vmem:[#allocation8 + $0x10c] ss:$16 sps:$4 sm:$0xff]  }
 0x112   :  { %1083 = vmatpush1.bf16.msra.mxu0 %v3079_v51  ;;  %1169 = vmatpush1.bf16.msra.mxu1 %v3082_v52  ;;  %v3169_v51 = vld [vmem:[#allocation8 + $0x100] ss:$16 sps:$4 sm:$0xff]   ;;  %v3172_v52 = vld [vmem:[#allocation8 + $0x108] ss:$16 sps:$4 sm:$0xff]  }
 0x113   :  { %1084 = vmatprep.subr.bf16.mxu0 %v3087_v53  ;;  %1170 = vmatprep.subr.bf16.mxu1 %v3090_v54  ;;  %v3177_v53 = vld [vmem:[#allocation8 + $0x124] ss:$16 sps:$4 sm:$0xff]   ;;  %v3180_v54 = vld [vmem:[#allocation8 + $0x12c] ss:$16 sps:$4 sm:$0xff]  }
 0x116   :  { %1085 = vmatpush1.bf16.msra.mxu0 %v3085_v55  ;;  %1171 = vmatpush1.bf16.msra.mxu1 %v3088_v56  ;;  %v3175_v55 = vld [vmem:[#allocation8 + $0x120] ss:$16 sps:$4 sm:$0xff]   ;;  %v3178_v56 = vld [vmem:[#allocation8 + $0x128] ss:$16 sps:$4 sm:$0xff]  }
 0x117   :  { %1086 = vmatprep.subr.bf16.mxu0 %v3093_v57  ;;  %1172 = vmatprep.subr.bf16.mxu1 %v3096_v58  ;;  %v3183_v57 = vld [vmem:[#allocation8 + $0x144] ss:$16 sps:$4 sm:$0xff]   ;;  %v3186_v58 = vld [vmem:[#allocation8 + $0x14c] ss:$16 sps:$4 sm:$0xff]  }
 0x11a   :  { %1087 = vmatpush1.bf16.msra.mxu0 %v3091_v59  ;;  %1173 = vmatpush1.bf16.msra.mxu1 %v3094_v60  ;;  %v3181_v59 = vld [vmem:[#allocation8 + $0x140] ss:$16 sps:$4 sm:$0xff]   ;;  %v3184_v60 = vld [vmem:[#allocation8 + $0x148] ss:$16 sps:$4 sm:$0xff]  }
 0x11b   :  { %1088 = vmatprep.subr.bf16.mxu0 %v3099_v61  ;;  %1174 = vmatprep.subr.bf16.mxu1 %v3102_v62  ;;  %v3189_v61 = vld [vmem:[#allocation8 + $0x164] ss:$16 sps:$4 sm:$0xff]   ;;  %v3192_v62 = vld [vmem:[#allocation8 + $0x16c] ss:$16 sps:$4 sm:$0xff]  }
 0x11e   :  { %1089 = vmatpush1.bf16.msra.mxu0 %v3097_v63  ;;  %1175 = vmatpush1.bf16.msra.mxu1 %v3100_v0  ;;  %v3187_v63 = vld [vmem:[#allocation8 + $0x160] ss:$16 sps:$4 sm:$0xff]   ;;  %v3190_v0 = vld [vmem:[#allocation8 + $0x168] ss:$16 sps:$4 sm:$0xff]  }
 0x11f   :  { %1090 = vmatprep.subr.bf16.mxu0 %v3105_v1  ;;  %1176 = vmatprep.subr.bf16.mxu1 %v3108_v2  ;;  %v3195_v1 = vld [vmem:[#allocation8 + $0x184] ss:$16 sps:$4 sm:$0xff]   ;;  %v3198_v2 = vld [vmem:[#allocation8 + $0x18c] ss:$16 sps:$4 sm:$0xff]  }
 0x122   :  { %1091 = vmatpush1.bf16.msra.mxu0 %v3103_v3  ;;  %1177 = vmatpush1.bf16.msra.mxu1 %v3106_v4  ;;  %v3193_v3 = vld [vmem:[#allocation8 + $0x180] ss:$16 sps:$4 sm:$0xff]   ;;  %v3196_v4 = vld [vmem:[#allocation8 + $0x188] ss:$16 sps:$4 sm:$0xff]  }
 0x123   :  { %1092 = vmatprep.subr.bf16.mxu0 %v3111_v5  ;;  %1178 = vmatprep.subr.bf16.mxu1 %v3114_v6  ;;  %v3201_v5 = vld [vmem:[#allocation8 + $0x1a4] ss:$16 sps:$4 sm:$0xff]   ;;  %v3204_v6 = vld [vmem:[#allocation8 + $0x1ac] ss:$16 sps:$4 sm:$0xff]  }
 0x126   :  { %1093 = vmatpush1.bf16.msra.mxu0 %v3109_v7  ;;  %1179 = vmatpush1.bf16.msra.mxu1 %v3112_v11  ;;  %v3199_v7 = vld [vmem:[#allocation8 + $0x1a0] ss:$16 sps:$4 sm:$0xff]   ;;  %v3202_v11 = vld [vmem:[#allocation8 + $0x1a8] ss:$16 sps:$4 sm:$0xff]  }
 0x127   :  { %1094 = vmatprep.subr.bf16.mxu0 %v3117_v13  ;;  %1180 = vmatprep.subr.bf16.mxu1 %v3120_v14  ;;  %v3207_v13 = vld [vmem:[#allocation8 + $0x1c4] ss:$16 sps:$4 sm:$0xff]   ;;  %v3210_v14 = vld [vmem:[#allocation8 + $0x1cc] ss:$16 sps:$4 sm:$0xff]  }
 0x12a   :  { %1095 = vmatpush1.bf16.msra.mxu0 %v3115_v15  ;;  %1181 = vmatpush1.bf16.msra.mxu1 %v3118_v17  ;;  %v3205_v15 = vld [vmem:[#allocation8 + $0x1c0] ss:$16 sps:$4 sm:$0xff]   ;;  %v3208_v17 = vld [vmem:[#allocation8 + $0x1c8] ss:$16 sps:$4 sm:$0xff]  }
 0x12b   :  { %1995 = vmatprep.subr.bf16.mxu0 %v3123_v18  ;;  %2081 = vmatprep.subr.bf16.mxu1 %v3126_v19  ;;  %v3213_v18 = vld [vmem:[#allocation8 + $0x1e4] ss:$16 sps:$4 sm:$0xff]   ;;  %v3216_v19 = vld [vmem:[#allocation8 + $0x1ec] ss:$16 sps:$4 sm:$0xff]  }
 0x12d   :  { %1097 = vmatmul.mubr.bf16.vlgmr.msra.gmra.mrb[0].mxu0 %v3643_v16  ;;  %1183 = vmatmul.mubr.bf16.vlgmr.msra.gmra.mrb[0].mxu1 %v3643_v16  ;;  %v3142_v16 = vld [vmem:[#allocation8 + $0x68] ss:$16 sps:$4 sm:$0xff]  }
 0x12e   :  { %1996 = vmatpush1.bf16.msra.mxu0 %v3121_v20  ;;  %2082 = vmatpush1.bf16.msra.mxu1 %v3124_v21  ;;  %v3211_v20 = vld [vmem:[#allocation8 + $0x1e0] ss:$16 sps:$4 sm:$0xff]   ;;  %v3214_v21 = vld [vmem:[#allocation8 + $0x1e8] ss:$16 sps:$4 sm:$0xff]  }
 0x12f   :  { %1997 = vmatprep.subr.bf16.mxu0 %v3129_v22  ;;  %2083 = vmatprep.subr.bf16.mxu1 %v3132_v23  ;;  %v3219_v22 = vld [vmem:[#allocation8 + $0x204] ss:$16 sps:$4 sm:$0xff]   ;;  %v3222_v23 = vld [vmem:[#allocation8 + $0x20c] ss:$16 sps:$4 sm:$0xff]  }
 0x132   :  { %1998 = vmatpush1.bf16.msra.mxu0 %v3127_v24  ;;  %2084 = vmatpush1.bf16.msra.mxu1 %v3130_v25  ;;  %v359_v24 = vld [vmem:[%s3687_s4] sm:$0xf] }
 0x133   :  { %1999 = vmatprep.subr.bf16.mxu0 %v3135_v26  ;;  %2085 = vmatprep.subr.bf16.mxu1 %v3138_v27  ;;  %v364_v25 = vrot.slane %v359_v24, %v3620_v8  ;;  %v372_v26 = vrot.slane %v359_v24, %v3624_v10  ;;  %v368_v27 = vrot.slane %v359_v24, %v3622_v9 }
 0x136   :  { %2000 = vmatpush1.bf16.msra.mxu0 %v3133_v28  ;;  %2086 = vmatpush1.bf16.msra.mxu1 %v3136_v29  ;;  %v376_v28 = vrot.slane %v359_v24, %v3626_v12  ;;  %v3264_v24 = vld [vmem:[#allocation8 + $0x2ec] ss:$16 sps:$4 sm:$0xff]  }
 0x137   :  { %2001 = vmatprep.subr.bf16.mxu0 %v3141_v30  ;;  %2087 = vmatprep.subr.bf16.mxu1 %v3144_v31 }
 0x13a   :  { %2002 = vmatpush1.bf16.msra.mxu0 %v3139_v32  ;;  %2088 = vmatpush1.bf16.msra.mxu1 %v3142_v16 }
 0x13b   :  { %2003 = vmatprep.subr.bf16.mxu0 %v3147_v33  ;;  %2089 = vmatprep.subr.bf16.mxu1 %v3150_v34 }
 0x13e   :  { %2004 = vmatpush1.bf16.msra.mxu0 %v3145_v35  ;;  %2090 = vmatpush1.bf16.msra.mxu1 %v3148_v36 }
 0x13f   :  { %2005 = vmatprep.subr.bf16.mxu0 %v3153_v37  ;;  %2091 = vmatprep.subr.bf16.mxu1 %v3156_v38 }
 0x142   :  { %2006 = vmatpush1.bf16.msra.mxu0 %v3151_v39  ;;  %2092 = vmatpush1.bf16.msra.mxu1 %v3154_v40 }
 0x143   :  { %2007 = vmatprep.subr.bf16.mxu0 %v3159_v41  ;;  %2093 = vmatprep.subr.bf16.mxu1 %v3162_v42 }
 0x146   :  { %2008 = vmatpush1.bf16.msra.mxu0 %v3157_v43  ;;  %2094 = vmatpush1.bf16.msra.mxu1 %v3160_v44 }
 0x147   :  { %2009 = vmatprep.subr.bf16.mxu0 %v3165_v45  ;;  %2095 = vmatprep.subr.bf16.mxu1 %v3168_v46 }
 0x14a   :  { %2010 = vmatpush1.bf16.msra.mxu0 %v3163_v47  ;;  %2096 = vmatpush1.bf16.msra.mxu1 %v3166_v48 }
 0x14b   :  { %2011 = vmatprep.subr.bf16.mxu0 %v3171_v49  ;;  %2097 = vmatprep.subr.bf16.mxu1 %v3174_v50 }
 0x14e   :  { %2012 = vmatpush1.bf16.msra.mxu0 %v3169_v51  ;;  %2098 = vmatpush1.bf16.msra.mxu1 %v3172_v52 }
 0x14f   :  { %2013 = vmatprep.subr.bf16.mxu0 %v3177_v53  ;;  %2099 = vmatprep.subr.bf16.mxu1 %v3180_v54 }
 0x152   :  { %2014 = vmatpush1.bf16.msra.mxu0 %v3175_v55  ;;  %2100 = vmatpush1.bf16.msra.mxu1 %v3178_v56  ;;  %v3217_v56 = vld [vmem:[#allocation8 + $0x200] ss:$16 sps:$4 sm:$0xff]  }
 0x153   :  { %2015 = vmatprep.subr.bf16.mxu0 %v3183_v57  ;;  %2101 = vmatprep.subr.bf16.mxu1 %v3186_v58  ;;  %v3220_v57 = vld [vmem:[#allocation8 + $0x208] ss:$16 sps:$4 sm:$0xff]   ;;  %v3225_v58 = vld [vmem:[#allocation8 + $0x224] ss:$16 sps:$4 sm:$0xff]  }
 0x156   :  { %2016 = vmatpush1.bf16.msra.mxu0 %v3181_v59  ;;  %2102 = vmatpush1.bf16.msra.mxu1 %v3184_v60  ;;  %v3228_v59 = vld [vmem:[#allocation8 + $0x22c] ss:$16 sps:$4 sm:$0xff]   ;;  %v3223_v60 = vld [vmem:[#allocation8 + $0x220] ss:$16 sps:$4 sm:$0xff]  }
 0x157   :  { %2017 = vmatprep.subr.bf16.mxu0 %v3189_v61  ;;  %2103 = vmatprep.subr.bf16.mxu1 %v3192_v62  ;;  %v3226_v61 = vld [vmem:[#allocation8 + $0x228] ss:$16 sps:$4 sm:$0xff]   ;;  %v3231_v62 = vld [vmem:[#allocation8 + $0x244] ss:$16 sps:$4 sm:$0xff]  }
 0x15a   :  { %2018 = vmatpush1.bf16.msra.mxu0 %v3187_v63  ;;  %2104 = vmatpush1.bf16.msra.mxu1 %v3190_v0  ;;  %v3234_v63 = vld [vmem:[#allocation8 + $0x24c] ss:$16 sps:$4 sm:$0xff]   ;;  %v3229_v0 = vld [vmem:[#allocation8 + $0x240] ss:$16 sps:$4 sm:$0xff]  }
 0x15b   :  { %2019 = vmatprep.subr.bf16.mxu0 %v3195_v1  ;;  %2105 = vmatprep.subr.bf16.mxu1 %v3198_v2  ;;  %v3232_v1 = vld [vmem:[#allocation8 + $0x248] ss:$16 sps:$4 sm:$0xff]   ;;  %v3237_v2 = vld [vmem:[#allocation8 + $0x264] ss:$16 sps:$4 sm:$0xff]  }
 0x15e   :  { %2020 = vmatpush1.bf16.msra.mxu0 %v3193_v3  ;;  %2106 = vmatpush1.bf16.msra.mxu1 %v3196_v4  ;;  %v3240_v3 = vld [vmem:[#allocation8 + $0x26c] ss:$16 sps:$4 sm:$0xff]   ;;  %v3235_v4 = vld [vmem:[#allocation8 + $0x260] ss:$16 sps:$4 sm:$0xff]  }
 0x15f   :  { %2021 = vmatprep.subr.bf16.mxu0 %v3201_v5  ;;  %2107 = vmatprep.subr.bf16.mxu1 %v3204_v6  ;;  %v3238_v5 = vld [vmem:[#allocation8 + $0x268] ss:$16 sps:$4 sm:$0xff]   ;;  %v3243_v6 = vld [vmem:[#allocation8 + $0x284] ss:$16 sps:$4 sm:$0xff]  }
 0x162   :  { %2022 = vmatpush1.bf16.msra.mxu0 %v3199_v7  ;;  %2108 = vmatpush1.bf16.msra.mxu1 %v3202_v11  ;;  %v3246_v7 = vld [vmem:[#allocation8 + $0x28c] ss:$16 sps:$4 sm:$0xff]   ;;  %v3241_v11 = vld [vmem:[#allocation8 + $0x280] ss:$16 sps:$4 sm:$0xff]  }
 0x163   :  { %2023 = vmatprep.subr.bf16.mxu0 %v3207_v13  ;;  %2109 = vmatprep.subr.bf16.mxu1 %v3210_v14  ;;  %v3244_v13 = vld [vmem:[#allocation8 + $0x288] ss:$16 sps:$4 sm:$0xff]   ;;  %v3249_v14 = vld [vmem:[#allocation8 + $0x2a4] ss:$16 sps:$4 sm:$0xff]  }
 0x166   :  { %2024 = vmatpush1.bf16.msra.mxu0 %v3205_v15  ;;  %2110 = vmatpush1.bf16.msra.mxu1 %v3208_v17  ;;  %v3252_v15 = vld [vmem:[#allocation8 + $0x2ac] ss:$16 sps:$4 sm:$0xff]   ;;  %v3247_v17 = vld [vmem:[#allocation8 + $0x2a0] ss:$16 sps:$4 sm:$0xff]  }
 0x167   :  { %2025 = vmatprep.subr.bf16.mxu0 %v3213_v18  ;;  %2111 = vmatprep.subr.bf16.mxu1 %v3216_v19  ;;  %v3250_v18 = vld [vmem:[#allocation8 + $0x2a8] ss:$16 sps:$4 sm:$0xff]   ;;  %v3255_v19 = vld [vmem:[#allocation8 + $0x2c4] ss:$16 sps:$4 sm:$0xff]  }
 0x16a   :  { %2026 = vmatpush1.bf16.msra.mxu0 %v3211_v20  ;;  %2112 = vmatpush1.bf16.msra.mxu1 %v3214_v21  ;;  %v3258_v20 = vld [vmem:[#allocation8 + $0x2cc] ss:$16 sps:$4 sm:$0xff]   ;;  %v3253_v21 = vld [vmem:[#allocation8 + $0x2c0] ss:$16 sps:$4 sm:$0xff]  }
 0x16b   :  { %2038 = vmatprep.subr.bf16.mxu0 %v3219_v22  ;;  %2124 = vmatprep.subr.bf16.mxu1 %v3222_v23  ;;  %v3256_v22 = vld [vmem:[#allocation8 + $0x2c8] ss:$16 sps:$4 sm:$0xff]   ;;  %v3261_v23 = vld [vmem:[#allocation8 + $0x2e4] ss:$16 sps:$4 sm:$0xff]  }
 0x200   :  { %v1098_v29 = vpop.f32.mrb[0].mxu0  ;;  %v1184_v30 = vpop.f32.mrb[0].mxu1 }
 0x201   :  { %v2880_v31 = vadd.f32 %v1098_v29, %v364_v25  ;;  %v2884_v32 = vadd.f32 %v1184_v30, %v372_v26  ;;  %v1100_v16 = vpop.f32.mrb[1].mxu0  ;;  %v1186_v33 = vpop.f32.mrb[1].mxu1  ;;  %v3265_v29 = vld [vmem:[#allocation8 + $0x300] ss:$16 sps:$4 sm:$0xff]   ;;  %v3268_v30 = vld [vmem:[#allocation8 + $0x308] ss:$16 sps:$4 sm:$0xff]  }
 0x202   :  { %v2881_v34 = vadd.f32 %v1100_v16, %v368_v27  ;;  %v2885_v35 = vadd.f32 %v1186_v33, %v376_v28  ;;  %v1102_v36 = vpop.f32.mrb[2].mxu0  ;;  %v1188_v37 = vpop.f32.mrb[2].mxu1  ;;  %v3271_v16 = vld [vmem:[#allocation8 + $0x320] ss:$16 sps:$4 sm:$0xff]   ;;  %v3274_v33 = vld [vmem:[#allocation8 + $0x328] ss:$16 sps:$4 sm:$0xff]  }
 0x203   :  { %v2882_v38 = vadd.f32 %v1102_v36, %v364_v25  ;;  %v2886_v39 = vadd.f32 %v1188_v37, %v372_v26  ;;  %v1104_v40 = vpop.f32.mrb[3].mxu0  ;;  %v1190_v41 = vpop.f32.mrb[3].mxu1  ;;  %v1193_v44 = vmax.f32 %v2880_v31, 0.0  ;;  %v1195_v45 = vmax.f32 %v2884_v32, 0.0  ;;  %v3259_v25 = vld [vmem:[#allocation8 + $0x2e0] ss:$16 sps:$4 sm:$0xff]  }
 0x204   :  { %v2883_v42 = vadd.f32 %v1104_v40, %v368_v27  ;;  %v2887_v43 = vadd.f32 %v1190_v41, %v376_v28  ;;  %v1194_v48 = vmax.f32 %v2881_v34, 0.0  ;;  %v1196_v49 = vmax.f32 %v2885_v35, 0.0  ;;  %v3262_v26 = vld [vmem:[#allocation8 + $0x2e8] ss:$16 sps:$4 sm:$0xff]   ;;  %v3267_v27 = vld [vmem:[#allocation8 + $0x304] ss:$16 sps:$4 sm:$0xff]  }
 0x205   :  { %v1197_v46 = vmax.f32 %v2882_v38, 0.0  ;;  %v1199_v47 = vmax.f32 %v2886_v39, 0.0  ;;  %v3270_v28 = vld [vmem:[#allocation8 + $0x30c] ss:$16 sps:$4 sm:$0xff]   ;;  %v3273_v31 = vld [vmem:[#allocation8 + $0x324] ss:$16 sps:$4 sm:$0xff]  }
 0x206   :  { %v1198_v50 = vmax.f32 %v2883_v42, 0.0  ;;  %v1200_v51 = vmax.f32 %v2887_v43, 0.0  ;;  %v3276_v32 = vld [vmem:[#allocation8 + $0x32c] ss:$16 sps:$4 sm:$0xff]   ;;  %v3279_v34 = vld [vmem:[#allocation8 + $0x344] ss:$16 sps:$4 sm:$0xff]  }
 0x207   :  { %v1201_v52 = vpack.c.bf16 %v1197_v46, %v1193_v44  ;;  %v3654_v53 = vpack.c.bf16 %v1199_v47, %v1195_v45  ;;  %v3282_v35 = vld [vmem:[#allocation8 + $0x34c] ss:$16 sps:$4 sm:$0xff]   ;;  %v3277_v36 = vld [vmem:[#allocation8 + $0x340] ss:$16 sps:$4 sm:$0xff]   ;;  %v3280_v37 = vld [vmem:[#allocation8 + $0x348] ss:$16 sps:$4 sm:$0xff]  }
 0x208   :  { %v1202_v54 = vpack.c.bf16 %v1198_v50, %v1194_v48  ;;  %v1204_v55 = vpack.c.bf16 %v1200_v51, %v1196_v49  ;;  %v3285_v38 = vld [vmem:[#allocation8 + $0x364] ss:$16 sps:$4 sm:$0xff]   ;;  %v3288_v39 = vld [vmem:[#allocation8 + $0x36c] ss:$16 sps:$4 sm:$0xff]   ;;  %v3283_v40 = vld [vmem:[#allocation8 + $0x360] ss:$16 sps:$4 sm:$0xff]  }
 0x209   :  { %v3286_v41 = vld [vmem:[#allocation8 + $0x368] ss:$16 sps:$4 sm:$0xff]   ;;  %v3291_v42 = vld [vmem:[#allocation8 + $0x384] ss:$16 sps:$4 sm:$0xff]   ;;  %v3294_v43 = vld [vmem:[#allocation8 + $0x38c] ss:$16 sps:$4 sm:$0xff]  }
 0x20a   :  { %2027 = vmatprep.mubr.bf16.mxu0 %v1202_v54  ;;  %2113 = vmatprep.mubr.bf16.mxu1 %v1202_v54  ;;  %v3289_v44 = vld [vmem:[#allocation8 + $0x380] ss:$16 sps:$4 sm:$0xff]   ;;  %v3292_v45 = vld [vmem:[#allocation8 + $0x388] ss:$16 sps:$4 sm:$0xff]   ;;  %v3297_v46 = vld [vmem:[#allocation8 + $0x3a4] ss:$16 sps:$4 sm:$0xff]  }
 0x20b   :  { %2028 = vmatmul.mubr.bf16.vlgmr.msra.gmra.mrb[4].mxu0 %v1201_v52  ;;  %2114 = vmatmul.mubr.bf16.vlgmr.msra.gmra.mrb[4].mxu1 %v1201_v52  ;;  %v3300_v47 = vld [vmem:[#allocation8 + $0x3ac] ss:$16 sps:$4 sm:$0xff]   ;;  %v3295_v48 = vld [vmem:[#allocation8 + $0x3a0] ss:$16 sps:$4 sm:$0xff]   ;;  %v3298_v49 = vld [vmem:[#allocation8 + $0x3a8] ss:$16 sps:$4 sm:$0xff]  }
 0x20c   :  { %2039 = vmatpush1.bf16.msra.mxu0 %v3217_v56  ;;  %2125 = vmatpush1.bf16.msra.mxu1 %v3220_v57  ;;  %v3303_v50 = vld [vmem:[#allocation8 + $0x3c4] ss:$16 sps:$4 sm:$0xff]   ;;  %v3306_v51 = vld [vmem:[#allocation8 + $0x3cc] ss:$16 sps:$4 sm:$0xff]   ;;  %v3301_v52 = vld [vmem:[#allocation8 + $0x3c0] ss:$16 sps:$4 sm:$0xff]  }
 0x20d   :  { %2070 = vmatprep.mubr.bf16.mxu0 %v1204_v55  ;;  %2156 = vmatprep.mubr.bf16.mxu1 %v1204_v55  ;;  %v3304_v54 = vld [vmem:[#allocation8 + $0x3c8] ss:$16 sps:$4 sm:$0xff]   ;;  %v3309_v55 = vld [vmem:[#allocation8 + $0x3e4] ss:$16 sps:$4 sm:$0xff]   ;;  %v3312_v56 = vld [vmem:[#allocation8 + $0x3ec] ss:$16 sps:$4 sm:$0xff]  }
 0x20e   :  { %2040 = vmatprep.subr.bf16.mxu0 %v3225_v58  ;;  %2126 = vmatprep.subr.bf16.mxu1 %v3228_v59  ;;  %v3307_v57 = vld [vmem:[#allocation8 + $0x3e0] ss:$16 sps:$4 sm:$0xff]   ;;  %v3310_v58 = vld [vmem:[#allocation8 + $0x3e8] ss:$16 sps:$4 sm:$0xff]  }
 0x20f   :  { %v3313_v59 = vld [vmem:[#allocation10 + $0x40] sm:$0xff]  }
 0x210   :  { %2041 = vmatpush1.bf16.msra.mxu0 %v3223_v60  ;;  %2127 = vmatpush1.bf16.msra.mxu1 %v3226_v61  ;;  %v3314_v60 = vld [vmem:[#allocation10 + $0xc0] sm:$0xff]  }
 0x211   :  { %2042 = vmatprep.subr.bf16.mxu0 %v3231_v62  ;;  %2128 = vmatprep.subr.bf16.mxu1 %v3234_v63  ;;  %v3315_v61 = vld [vmem:[#allocation10] sm:$0xff]   ;;  %v3317_v63 = vld [vmem:[#allocation10 + $0x48] sm:$0xff]  }
 0x212   :  { %v3316_v62 = vld [vmem:[#allocation10 + $0x80] sm:$0xff]  }
 0x214   :  { %2043 = vmatpush1.bf16.msra.mxu0 %v3229_v0  ;;  %2129 = vmatpush1.bf16.msra.mxu1 %v3232_v1  ;;  %v3318_v0 = vld [vmem:[#allocation10 + $0xc8] sm:$0xff]  }
 0x215   :  { %2044 = vmatprep.subr.bf16.mxu0 %v3237_v2  ;;  %2130 = vmatprep.subr.bf16.mxu1 %v3240_v3  ;;  %v3319_v1 = vld [vmem:[#allocation10 + $0x8] sm:$0xff]   ;;  %v3321_v3 = vld [vmem:[#allocation10 + $0x50] sm:$0xff]  }
 0x216   :  { %v3320_v2 = vld [vmem:[#allocation10 + $0x88] sm:$0xff]  }
 0x218   :  { %2045 = vmatpush1.bf16.msra.mxu0 %v3235_v4  ;;  %2131 = vmatpush1.bf16.msra.mxu1 %v3238_v5  ;;  %v3322_v4 = vld [vmem:[#allocation10 + $0xd0] sm:$0xff]  }
 0x219   :  { %2046 = vmatprep.subr.bf16.mxu0 %v3243_v6  ;;  %2132 = vmatprep.subr.bf16.mxu1 %v3246_v7  ;;  %v3323_v5 = vld [vmem:[#allocation10 + $0x10] sm:$0xff]   ;;  %v3325_v7 = vld [vmem:[#allocation10 + $0x58] sm:$0xff]  }
 0x21a   :  { %v3324_v6 = vld [vmem:[#allocation10 + $0x90] sm:$0xff]  }
 0x21c   :  { %2047 = vmatpush1.bf16.msra.mxu0 %v3241_v11  ;;  %2133 = vmatpush1.bf16.msra.mxu1 %v3244_v13  ;;  %v3326_v11 = vld [vmem:[#allocation10 + $0xd8] sm:$0xff]  }
 0x21d   :  { %2048 = vmatprep.subr.bf16.mxu0 %v3249_v14  ;;  %2134 = vmatprep.subr.bf16.mxu1 %v3252_v15  ;;  %v3327_v13 = vld [vmem:[#allocation10 + $0x18] sm:$0xff]   ;;  %v3329_v14 = vld [vmem:[#allocation10 + $0x60] sm:$0xff]  }
 0x21e   :  { %v3330_v15 = vld [vmem:[#allocation10 + $0xe0] sm:$0xff]  }
 0x220   :  { %2049 = vmatpush1.bf16.msra.mxu0 %v3247_v17  ;;  %2135 = vmatpush1.bf16.msra.mxu1 %v3250_v18  ;;  %v3331_v17 = vld [vmem:[#allocation10 + $0x20] sm:$0xff]  }
 0x221   :  { %2050 = vmatprep.subr.bf16.mxu0 %v3255_v19  ;;  %2136 = vmatprep.subr.bf16.mxu1 %v3258_v20  ;;  %v3332_v18 = vld [vmem:[#allocation10 + $0xa0] sm:$0xff]   ;;  %v3333_v19 = vld [vmem:[#allocation10 + $0x68] sm:$0xff]  }
 0x222   :  { %v3334_v20 = vld [vmem:[#allocation10 + $0xe8] sm:$0xff]  }
 0x224   :  { %2051 = vmatpush1.bf16.msra.mxu0 %v3253_v21  ;;  %2137 = vmatpush1.bf16.msra.mxu1 %v3256_v22  ;;  %v3335_v21 = vld [vmem:[#allocation10 + $0x28] sm:$0xff]  }
 0x225   :  { %2052 = vmatprep.subr.bf16.mxu0 %v3261_v23  ;;  %2138 = vmatprep.subr.bf16.mxu1 %v3264_v24  ;;  %v3336_v22 = vld [vmem:[#allocation10 + $0xa8] sm:$0xff]   ;;  %v3337_v23 = vld [vmem:[#allocation10 + $0x70] sm:$0xff]  }
 0x226   :  { %v3338_v24 = vld [vmem:[#allocation10 + $0xf0] sm:$0xff]  }
 0x228   :  { %2053 = vmatpush1.bf16.msra.mxu0 %v3259_v25  ;;  %2139 = vmatpush1.bf16.msra.mxu1 %v3262_v26  ;;  %v3339_v25 = vld [vmem:[#allocation10 + $0x30] sm:$0xff]  }
 0x229   :  { %2054 = vmatprep.subr.bf16.mxu0 %v3267_v27  ;;  %2140 = vmatprep.subr.bf16.mxu1 %v3270_v28  ;;  %v3340_v26 = vld [vmem:[#allocation10 + $0xb0] sm:$0xff]   ;;  %v3341_v27 = vld [vmem:[#allocation10 + $0x78] sm:$0xff]  }
 0x22a   :  { %v3342_v28 = vld [vmem:[#allocation10 + $0xf8] sm:$0xff]  }
 0x22c   :  { %2055 = vmatpush1.bf16.msra.mxu0 %v3265_v29  ;;  %2141 = vmatpush1.bf16.msra.mxu1 %v3268_v30  ;;  %v3343_v29 = vld [vmem:[#allocation10 + $0x38] sm:$0xff]  }
 0x22d   :  { %2056 = vmatprep.subr.bf16.mxu0 %v3273_v31  ;;  %2142 = vmatprep.subr.bf16.mxu1 %v3276_v32  ;;  %v3344_v30 = vld [vmem:[#allocation10 + $0xb8] sm:$0xff]   ;;  %v1333_v31 = vld [vmem:[%s3689_s6] sm:$0xf] }
 0x22e   :  { %v1338_v32 = vrot.slane %v1333_v31, %v3620_v8 }
 0x230   :  { %2057 = vmatpush1.bf16.msra.mxu0 %v3271_v16  ;;  %2143 = vmatpush1.bf16.msra.mxu1 %v3274_v33  ;;  %v1346_v16 = vrot.slane %v1333_v31, %v3624_v10  ;;  %v1342_v33 = vrot.slane %v1333_v31, %v3622_v9 }
 0x231   :  { %2058 = vmatprep.subr.bf16.mxu0 %v3279_v34  ;;  %2144 = vmatprep.subr.bf16.mxu1 %v3282_v35  ;;  %v1350_v34 = vrot.slane %v1333_v31, %v3626_v12 }
 0x234   :  { %2059 = vmatpush1.bf16.msra.mxu0 %v3277_v36  ;;  %2145 = vmatpush1.bf16.msra.mxu1 %v3280_v37 }
 0x235   :  { %2060 = vmatprep.subr.bf16.mxu0 %v3285_v38  ;;  %2146 = vmatprep.subr.bf16.mxu1 %v3288_v39 }
 0x238   :  { %2061 = vmatpush1.bf16.msra.mxu0 %v3283_v40  ;;  %2147 = vmatpush1.bf16.msra.mxu1 %v3286_v41 }
 0x239   :  { %2062 = vmatprep.subr.bf16.mxu0 %v3291_v42  ;;  %2148 = vmatprep.subr.bf16.mxu1 %v3294_v43 }
 0x23c   :  { %2063 = vmatpush1.bf16.msra.mxu0 %v3289_v44  ;;  %2149 = vmatpush1.bf16.msra.mxu1 %v3292_v45 }
 0x23d   :  { %2064 = vmatprep.subr.bf16.mxu0 %v3297_v46  ;;  %2150 = vmatprep.subr.bf16.mxu1 %v3300_v47 }
 0x240   :  { %2065 = vmatpush1.bf16.msra.mxu0 %v3295_v48  ;;  %2151 = vmatpush1.bf16.msra.mxu1 %v3298_v49 }
 0x241   :  { %2066 = vmatprep.subr.bf16.mxu0 %v3303_v50  ;;  %2152 = vmatprep.subr.bf16.mxu1 %v3306_v51 }
 0x244   :  { %2067 = vmatpush1.bf16.msra.mxu0 %v3301_v52  ;;  %2153 = vmatpush1.bf16.msra.mxu1 %v3304_v54 }
 0x245   :  { %2068 = vmatprep.subr.bf16.mxu0 %v3309_v55  ;;  %2154 = vmatprep.subr.bf16.mxu1 %v3312_v56 }
 0x248   :  { %2069 = vmatpush1.bf16.msra.mxu0 %v3307_v57  ;;  %2155 = vmatpush1.bf16.msra.mxu1 %v3310_v58 }
 0x249   :  { %2836 = vmatprep.subr.bf16.mxu0 %v3313_v59  ;;  %2858 = vmatprep.subr.bf16.mxu1 %v3314_v60 }
 0x24b   :  { %2071 = vmatmul.mubr.bf16.vlgmr.msra.gmra.mrb[4].mxu0 %v3654_v53  ;;  %2157 = vmatmul.mubr.bf16.vlgmr.msra.gmra.mrb[4].mxu1 %v3654_v53  ;;  %v3328_v53 = vld [vmem:[#allocation10 + $0x98] sm:$0xff]  }
 0x24c   :  { %2837 = vmatpush3.bf16.msra.mxu0 %v3315_v61  ;;  %2859 = vmatpush3.bf16.msra.mxu1 %v3316_v62  ;;  %v2803_v62 = vld [vmem:[%s3691_s8] ss:$0 sm:$0xff]  ;;  %s3457_s8 = scalar_lea.vmem %s2534_s15, 256 }
 0x24d   :  { %2838 = vmatprep.subr.bf16.mxu0 %v3317_v63  ;;  %2860 = vmatprep.subr.bf16.mxu1 %v3318_v0  ;;  %p3458_p12 = scmp.ne.s32.totalorder %s2534_s15, %s3457_s8  ;;  %p3463_p0 = scmp.lt.s32.totalorder %s3457_s8, %s3457_s8 }
 0x24f   :  { %p3464_p1 = por %p3463_p0, %p3462_p13 }
 0x250   :  { %2839 = vmatpush3.bf16.msra.mxu0 %v3319_v1  ;;  %2861 = vmatpush3.bf16.msra.mxu1 %v3320_v2 }
 0x251   :  { %2840 = vmatprep.subr.bf16.mxu0 %v3321_v3  ;;  %2862 = vmatprep.subr.bf16.mxu1 %v3322_v4  ;;  %p3465_p2 = pnand %p3464_p1, %p3458_p12 }
 0x254   :  { %2841 = vmatpush3.bf16.msra.mxu0 %v3323_v5  ;;  %2863 = vmatpush3.bf16.msra.mxu1 %v3324_v6 }
 0x255   :  { %2842 = vmatprep.subr.bf16.mxu0 %v3325_v7  ;;  %2864 = vmatprep.subr.bf16.mxu1 %v3326_v11 }
 0x258   :  { %2843 = vmatpush3.bf16.msra.mxu0 %v3327_v13  ;;  %2865 = vmatpush3.bf16.msra.mxu1 %v3328_v53 }
 0x259   :  { %2844 = vmatprep.subr.bf16.mxu0 %v3329_v14  ;;  %2866 = vmatprep.subr.bf16.mxu1 %v3330_v15  ;;  %v3345_v15 = vld [vmem:[#allocation2] sm:$0xff] }
 0x25c   :  { %2845 = vmatpush3.bf16.msra.mxu0 %v3331_v17  ;;  %2867 = vmatpush3.bf16.msra.mxu1 %v3332_v18 }
 0x25d   :  { %2846 = vmatprep.subr.bf16.mxu0 %v3333_v19  ;;  %2868 = vmatprep.subr.bf16.mxu1 %v3334_v20  ;;  %v3346_v19 = vld [vmem:[#allocation2 + $0x8] sm:$0xff] }
 0x260   :  { %2847 = vmatpush3.bf16.msra.mxu0 %v3335_v21  ;;  %2869 = vmatpush3.bf16.msra.mxu1 %v3336_v22 }
 0x261   :  { %2848 = vmatprep.subr.bf16.mxu0 %v3337_v23  ;;  %2870 = vmatprep.subr.bf16.mxu1 %v3338_v24 }
 0x264   :  { %2849 = vmatpush3.bf16.msra.mxu0 %v3339_v25  ;;  %2871 = vmatpush3.bf16.msra.mxu1 %v3340_v26 }
 0x265   :  { %2850 = vmatprep.subr.bf16.mxu0 %v3341_v27  ;;  %2872 = vmatprep.subr.bf16.mxu1 %v3342_v28 }
 0x268   :  { %2851 = vmatpush3.bf16.msra.mxu0 %v3343_v29  ;;  %2873 = vmatpush3.bf16.msra.mxu1 %v3344_v30 }
 0x31e   :  { %v2072_v35 = vpop.f32.mrb[4].mxu0  ;;  %v2158_v36 = vpop.f32.mrb[4].mxu1 }
 0x31f   :  { %v2888_v37 = vadd.f32 %v2072_v35, %v1338_v32  ;;  %v2892_v38 = vadd.f32 %v2158_v36, %v1346_v16  ;;  %v2074_v39 = vpop.f32.mrb[5].mxu0  ;;  %v2160_v40 = vpop.f32.mrb[5].mxu1 }
 0x320   :  { %v2889_v41 = vadd.f32 %v2074_v39, %v1342_v33  ;;  %v2893_v42 = vadd.f32 %v2160_v40, %v1350_v34  ;;  %v2076_v43 = vpop.f32.mrb[6].mxu0  ;;  %v2162_v44 = vpop.f32.mrb[6].mxu1 }
 0x321   :  { %v2890_v45 = vadd.f32 %v2076_v43, %v1338_v32  ;;  %v2894_v46 = vadd.f32 %v2162_v44, %v1346_v16  ;;  %v2078_v47 = vpop.f32.mrb[7].mxu0  ;;  %v2164_v8 = vpop.f32.mrb[7].mxu1  ;;  %v2167_v49 = vmax.f32 %v2888_v37, 0.0  ;;  %v2169_v9 = vmax.f32 %v2892_v38, 0.0 }
 0x322   :  { %v2891_v48 = vadd.f32 %v2078_v47, %v1342_v33  ;;  %v2895_v10 = vadd.f32 %v2164_v8, %v1350_v34  ;;  %v2168_v51 = vmax.f32 %v2889_v41, 0.0  ;;  %v2170_v52 = vmax.f32 %v2893_v42, 0.0 }
 0x323   :  { %v2171_v50 = vmax.f32 %v2890_v45, 0.0  ;;  %v2173_v12 = vmax.f32 %v2894_v46, 0.0 }
 0x324   :  { %v2172_v54 = vmax.f32 %v2891_v48, 0.0  ;;  %v2174_v55 = vmax.f32 %v2895_v10, 0.0 }
 0x325   :  { %v2175_v56 = vpack.c.bf16 %v2171_v50, %v2167_v49  ;;  %v2177_v57 = vpack.c.bf16 %v2173_v12, %v2169_v9 }
 0x326   :  { %v2176_v58 = vpack.c.bf16 %v2172_v54, %v2168_v51  ;;  %v2178_v59 = vpack.c.bf16 %v2174_v55, %v2170_v52 }
 0x328   :  { %2474 = vmatprep.mubr.bf16.mxu0 %v2176_v58  ;;  %2515 = vmatprep.mubr.bf16.mxu1 %v2178_v59 }
 0x329   :  { %2475 = vmatmul.mubr.bf16.vlgmr.msra.gmra.mrb[8].mxu0 %v2175_v56  ;;  %2516 = vmatmul.mubr.bf16.vlgmr.msra.gmra.mrb[8].mxu1 %v2177_v57 }
 0x3fc   :  { %v2852_v60 = vpop.f32.mrb[8].mxu0  ;;  %v2874_v61 = vpop.f32.mrb[8].mxu1 }
 0x3fd   :  { %v2853_v63 = vpop.f32.mrb[9].mxu0  ;;  %v2875_v0 = vpop.f32.mrb[9].mxu1 }
 0x3fe   :  { %v2854_v1 = vadd.f32 %v2853_v63, %v2852_v60  ;;  %v2876_v2 = vadd.f32 %v2875_v0, %v2874_v61  ;;  %v2855_v3 = vpop.f32.mrb[10].mxu0  ;;  %v2877_v4 = vpop.f32.mrb[10].mxu1 }
 0x3ff   :  { %v2856_v5 = vpop.f32.mrb[11].mxu0  ;;  %v2878_v6 = vpop.f32.mrb[11].mxu1 }
 0x400   :  { %v2477_v7 = vadd.f32 %v2854_v1, %v2803_v62  ;;  %v2857_v11 = vadd.f32 %v2856_v5, %v2855_v3  ;;  %v2879_v13 = vadd.f32 %v2878_v6, %v2877_v4 }
 0x402   :  { %v2518_v53 = vadd.f32 %v2876_v2, %v2477_v7  ;;  %v2480_v14 = vadd.f32 %v2857_v11, %v2803_v62 }
 0x404   :  { %v2524_v17 = vadd.f32 %v3345_v15, %v2518_v53  ;;  %v2521_v18 = vadd.f32 %v2879_v13, %v2480_v14 }
 0x406   :  { %2526 = vst [vmem:[#allocation11] sm:$0xff] %v2524_v17  ;;  %v2525_v20 = vadd.f32 %v3346_v19, %v2521_v18 }
 0x408   :  { %2527 = vst [vmem:[#allocation11 + $0x8] sm:$0xff] %v2525_v20 }
 0x409   :  { %3468 = shalt.err (!%p3465_p2)
}
 0x40a   :  { %s3469_s0 = scalar_lea.hbm %s3692_s9, 256 }
 0x40b   :  { %p3470_p3 = scmp.ne.s32.totalorder %s3692_s9, %s3469_s0  ;;  %p3473_p4 = scmp.lt.u32.totalorder %s3469_s0, %s3692_s9 }
 0x40d   :  { %p3475_p5 = pnand %p3473_p4, %p3470_p3 }
 0x40f   :  { %3478 = shalt.err (!%p3475_p5)
}
 0x410   :  { %2539 = dma.vmem_to_hbm [thread:$0]  %s2534_s15, 256, %s3692_s9, [#allocation4], %s3492_s5, %s3492_s5, %s3493_s22  }
 0x411   :  { %3485 = dma.done.wait [#allocation4], 256  }
 0x412   :  { %3486 = vsyncadd [#allocation4], 4294967040 }
 0x413   :  { %2543 = vsyncpa [#allocation3], 1 }
 0x414   :  { %2544 = vsyncpa [#allocation6], 1 }
 0x415   :  { %2545 = vsyncpa [#allocation9], 1 }
 0x416   :  { %2546 = vsyncpa [#allocation4], 1 }

</bundles_post_ra>
